<compile_context>
chip_gen: v7x
topology: tpu7x:2x2x1
jax: 0.10.0
libtpu: 0.0.40
codegen_flags: <defaults>
</compile_context>

<pallas_src>
import functools

import jax
import jax.numpy as jnp
from jax.experimental import pallas as pl
from jax.experimental.pallas import tpu as pltpu


# ----------------------------------------------------------------------------
# helpers
# ----------------------------------------------------------------------------
def _keep_threshold(rate: float) -> int:
    """Keep an element iff its uniform uint32 draw >= rate * 2**32 (P(keep)=1-rate)."""
    return min(int(round(float(rate) * float(1 << 32))), (1 << 32) - 1)


# ----------------------------------------------------------------------------
# kernels
# ----------------------------------------------------------------------------
def _dropout_kernel(z_ref, bits_ref, o_ref, *, rate):
    """One-shot dropout prologue over an (rows_tile, D) block."""
    thr = jnp.uint32(_keep_threshold(rate))
    scale = jnp.float32(1.0 / (1.0 - rate))
    keep = bits_ref[...] >= thr                       # single integer compare
    o_ref[...] = jnp.where(keep, z_ref[...] * scale, 0.0).astype(o_ref.dtype)


def _inner_product_kernel(zrow_ref, zcolT_ref, o_ref, *, compute_dtype):
    """(tm, D) x (D, tn) -> (tm, tn) with f32 MXU accumulation."""
    a = zrow_ref[...].astype(compute_dtype)           # (tm, D)
    b = zcolT_ref[...].astype(compute_dtype)          # (D, tn)  lane-dense
    o_ref[...] = jnp.dot(
        a, b, preferred_element_type=jnp.float32
    ).astype(o_ref.dtype)


# ----------------------------------------------------------------------------
# wrappers
# ----------------------------------------------------------------------------
def _apply_dropout(z, rate, rng_key, *, rows_tile=1024):
    """Apply dropout once to the tiny (N, D) latent matrix (Pallas prologue)."""
    N, D = z.shape
    # Host-side uniform uint32 draws (deterministic, testable); consumed
    # in-kernel via a single integer threshold compare.
    bits = jax.random.bits(rng_key, z.shape, dtype=jnp.uint32)
    rt = min(int(rows_tile), N)
    spec = pl.BlockSpec((rt, D), lambda i: (i, 0))
    return pl.pallas_call(
        functools.partial(_dropout_kernel, rate=float(rate)),
        out_shape=jax.ShapeDtypeStruct((N, D), z.dtype),
        grid=(pl.cdiv(N, rt),),
        in_specs=[spec, spec],
        out_specs=spec,
        compiler_params=pltpu.CompilerParams(
            dimension_semantics=("parallel",)),
    )(z, bits)


def decoder_forward(z, *, dropout: float = 0.5, training: bool = False,
                    rng_key=None, tile_m: int = 512, tile_n: int = 1024,
                    matmul_dtype=None, out_dtype=None,
                    vmem_limit_bytes: int = 48 * 1024 * 1024):
    """adj_recon = dropout(z) @ dropout(z).T (same mask for both operands)."""
    N, D = z.shape
    out_dtype = z.dtype if out_dtype is None else out_dtype
    matmul_dtype = z.dtype if matmul_dtype is None else matmul_dtype

    use_dropout = training and float(dropout) > 0.0
    if use_dropout:
        if not (0.0 < float(dropout) < 1.0):
            raise ValueError("dropout rate must be in [0, 1)")
        if rng_key is None:
            rng_key = jax.random.PRNGKey(0)
        z = _apply_dropout(z, float(dropout), rng_key)

    # Tiny (N, D) -> (D, N) layout plumbing so the column block is lane-dense
    # and the contraction is the MXU-native (M,K)x(K,N) form.
    zt = z.T

    tm = min(int(tile_m), N)          # defaults are multiples of 8 / 128;
    tn = min(int(tile_n), N)          # full-dim blocks are always legal.
    grid = (pl.cdiv(N, tm), pl.cdiv(N, tn))   # j fastest -> row block reused

    row_spec = pl.BlockSpec((tm, D), lambda i, j: (i, 0))
    colT_spec = pl.BlockSpec((D, tn), lambda i, j: (0, j))
    out_spec = pl.BlockSpec((tm, tn), lambda i, j: (i, j))

    kernel = functools.partial(_inner_product_kernel, compute_dtype=matmul_dtype)
    # TODO(synk): if the downstream loss can consume a triangular output, write
    # only the j >= i tiles to halve the dominant (N, N) HBM write traffic.
    return pl.pallas_call(
        kernel,
        out_shape=jax.ShapeDtypeStruct((N, N), out_dtype),
        grid=grid,
        in_specs=[row_spec, colT_spec],
        out_specs=out_spec,
        compiler_params=pltpu.CompilerParams(
            dimension_semantics=("parallel", "parallel"),
            vmem_limit_bytes=int(vmem_limit_bytes),
        ),
    )(z, zt)


# ----------------------------------------------------------------------------
# self-test
# ----------------------------------------------------------------------------
if __name__ == "__main__":
    key = jax.random.PRNGKey(0)
    N, D = 512, 32                                 # num_nodes, latent_dim
    z = jax.random.normal(key, (N, D), dtype=jnp.float32)
    ref_eval = z @ z.T

    # --- Eval path (dropout is identity), default large tiles.
    out_eval = jax.block_until_ready(
        decoder_forward(z, dropout=0.5, training=False))
    assert out_eval.shape == (N, N)
    assert jnp.allclose(out_eval, ref_eval, atol=1e-3, rtol=1e-3)

    # --- Eval path with small explicit tiles to exercise a (4, 2) grid.
    out_tiled = jax.block_until_ready(
        decoder_forward(z, dropout=0.5, training=False, tile_m=128, tile_n=256))
    assert jnp.allclose(out_tiled, ref_eval, atol=1e-3, rtol=1e-3)

    # --- Ragged N (not a tile multiple): pl.cdiv grid with edge blocks.
    zr = jax.random.normal(jax.random.PRNGKey(2), (320, D), dtype=jnp.float32)
    out_ragged = jax.block_until_ready(
        decoder_forward(zr, dropout=0.5, training=False, tile_m=256, tile_n=256))
    assert out_ragged.shape == (320, 320)
    assert jnp.allclose(out_ragged, zr @ zr.T, atol=1e-3, rtol=1e-3)

    # --- Training path: deterministic mask from a fixed key; compare against a
    #     pure-JAX reference applying the identical mask.
    rate = 0.5
    drop_key = jax.random.PRNGKey(1)
    out_train = jax.block_until_ready(
        decoder_forward(z, dropout=rate, training=True, rng_key=drop_key))
    bits_ref = jax.random.bits(drop_key, (N, D), dtype=jnp.uint32)
    keep_ref = bits_ref >= jnp.uint32(_keep_threshold(rate))
    z_drop = jnp.where(keep_ref, z * (1.0 / (1.0 - rate)), 0.0)
    ref_train = z_drop @ z_drop.T
    assert out_train.shape == (N, N)
    assert jnp.allclose(out_train, ref_train, atol=1e-3, rtol=1e-3)
    assert bool(jnp.all(jnp.isfinite(out_train)))

    print("KERNEL_OK")
</pallas_src>

<mosaic_0001>
module attributes {stable_mosaic.version = 11 : i64} {
  func.func @_inner_product_kernel(%arg0: i32, %arg1: i32, %arg2: memref<512x32xf32, #tpu.memory_space<vmem>>, %arg3: memref<32x512xf32, #tpu.memory_space<vmem>>, %arg4: memref<512x512xf32, #tpu.memory_space<vmem>>) attributes {dimension_semantics = [#tpu.dimension_semantics<parallel>, #tpu.dimension_semantics<parallel>], iteration_bounds = array<i64: 1, 1>, scalar_prefetch = 0 : i64, scratch_operands = 0 : i64, tpu.core_type = #tpu.core_type<tc>, window_params = [{transform_indices = @transform_0, window_bounds = array<i64: 512, 32>}, {transform_indices = @transform_1, window_bounds = array<i64: 32, 512>}, {transform_indices = @transform_2, window_bounds = array<i64: 512, 512>}]} {
    %c0 = arith.constant 0 : index
    %c0_0 = arith.constant 0 : index
    %0 = vector.load %arg2[%c0, %c0_0] : memref<512x32xf32, #tpu.memory_space<vmem>>, vector<512x32xf32>
    %c0_1 = arith.constant 0 : index
    %c0_2 = arith.constant 0 : index
    %1 = vector.load %arg3[%c0_1, %c0_2] : memref<32x512xf32, #tpu.memory_space<vmem>>, vector<32x512xf32>
    %cst = arith.constant dense<0.000000e+00> : vector<512x512xf32>
    %2 = tpu.matmul %0, %1, %cst {dimension_numbers = #tpu.dot_dimension_numbers<[1], [0], [0], [1], [0, 0, 1, 1], [], []>} : vector<512x32xf32>, vector<32x512xf32>, vector<512x512xf32> -> vector<512x512xf32>
    %c0_3 = arith.constant 0 : index
    %c0_4 = arith.constant 0 : index
    %3 = vector.load %arg4[%c0_3, %c0_4] : memref<512x512xf32, #tpu.memory_space<vmem>>, vector<512x512xf32>
    tpu.vector_store %arg4[%c0_3, %c0_4], %2 {strides = array<i32>} : memref<512x512xf32, #tpu.memory_space<vmem>>, vector<512x512xf32>,
    return
  }
  func.func @transform_0(%arg0: i32, %arg1: i32) -> (i32, i32) {
    %c0_i32 = arith.constant 0 : i32
    %c0_i32_0 = arith.constant 0 : i32
    return %arg0, %c0_i32 : i32, i32
  }
  func.func @transform_1(%arg0: i32, %arg1: i32) -> (i32, i32) {
    %c0_i32 = arith.constant 0 : i32
    %c0_i32_0 = arith.constant 0 : i32
    return %c0_i32, %arg1 : i32, i32
  }
  func.func @transform_2(%arg0: i32, %arg1: i32) -> (i32, i32) {
    %c0_i32 = arith.constant 0 : i32
    return %arg0, %arg1 : i32, i32
  }
}

</mosaic_0001>

<bundles_post_ra>
// kernel: tpu_custom_call.1
= control target key start
LH: loop header
LB: loop body
LE: loop exit
PB: predicated region body
PF: predicated region fallthrough
CT: control target
= control target key end

     0   :  { %v1627_v7 = vmov 0.0   ;;  %vm92_vm0 = vcmask 261120   ;;  %s2154_s0 = inlined_call_operand.vmem [shape: f32[512,32], index: 0, kind: input, shape index: {}]   ;;  %s2155_s1 = inlined_call_operand.vmem [shape: f32[32,512], index: 1, kind: input, shape index: {}]   ;;  %s2156_s2 = inlined_call_operand.hbm [shape: f32[512,512], index: 2, kind: output, shape index: {}]  }
   0x1   :  { %v77_v0 = vld [vmem:[%s2155_s1 + $0x8] sm:$0xff]  ;;  %v79_v2 = vld [vmem:[%s2155_s1 + $0x18] sm:$0xff]  ;;  %v76_v5 = vld [vmem:[%s2155_s1] sm:$0xff]  ;;  %349 = vmatprep.mubr.f32.mxu0 %v1627_v7  ;;  %798 = vmatprep.mubr.f32.mxu1 %v1627_v7 }
   0x2   :  { %v81_v1 = vld [vmem:[%s2155_s1 + $0x28] sm:$0xff]  ;;  %v83_v4 = vld [vmem:[%s2155_s1 + $0x38] sm:$0xff]  ;;  %v80_v6 = vld [vmem:[%s2155_s1 + $0x20] sm:$0xff] }
   0x3   :  { %v1583_v3 = vpack.c.bf16 %v81_v1, %v77_v0  ;;  %v1591_v8 = vpack.c.bf16 %v83_v4, %v79_v2  ;;  %v1585_v9 = vpack.c.bf16 %v80_v6, %v76_v5  ;;  %v78_v10 = vld [vmem:[%s2155_s1 + $0x10] sm:$0xff]  ;;  %v85_v12 = vld [vmem:[%s2155_s1 + $0x48] sm:$0xff]  ;;  %v87_v15 = vld [vmem:[%s2155_s1 + $0x58] sm:$0xff] }
   0x4   :  { %v82_v11 = vld [vmem:[%s2155_s1 + $0x30] sm:$0xff]  ;;  %v89_v14 = vld [vmem:[%s2155_s1 + $0x68] sm:$0xff]  ;;  %v91_v16 = vld [vmem:[%s2155_s1 + $0x78] sm:$0xff] }
   0x5   :  { %1584 = vmatprep.subr.bf16.mxu0 %v1583_v3  ;;  %v1593_v13 = vpack.c.bf16 %v82_v11, %v78_v10  ;;  %1592 = vmatprep.subr.bf16.mxu1 %v1591_v8  ;;  %v1587_v17 = vpack.c.bf16 %v89_v14, %v85_v12  ;;  %v1595_v18 = vpack.c.bf16 %v91_v16, %v87_v15  ;;  %v84_v19 = vld [vmem:[%s2155_s1 + $0x40] sm:$0xff]  ;;  %v86_v21 = vld [vmem:[%s2155_s1 + $0x50] sm:$0xff]  ;;  %v13_v26 = vld [vmem:[%s2154_s0 + $0x8] sm:$0xff] }
   0x6   :  { %1586 = vmatpush1.bf16.msra.mxu0 %v1585_v9  ;;  %v88_v20 = vld [vmem:[%s2155_s1 + $0x60] sm:$0xff]  ;;  %v90_v23 = vld [vmem:[%s2155_s1 + $0x70] sm:$0xff] }
   0x7   :  { %1594 = vmatpush1.bf16.msra.mxu1 %v1593_v13  ;;  %v1589_v22 = vpack.c.bf16 %v88_v20, %v84_v19  ;;  %1588 = vmatprep.subr.bf16.mxu0 %v1587_v17  ;;  %v1597_v24 = vpack.c.bf16 %v90_v23, %v86_v21  ;;  %v12_v25 = vld [vmem:[%s2154_s0] sm:$0xff]  ;;  %v14_v27 = vld [vmem:[%s2154_s0 + $0x10] sm:$0xff] }
   0x8   :  { %1596 = vmatprep.subr.bf16.mxu1 %v1595_v18 }
   0xa   :  { %1590 = vmatpush1.bf16.msra.mxu0 %v1589_v22 }
   0xb   :  { %1598 = vmatpush1.bf16.msra.mxu1 %v1597_v24 }
   0xd   :  { %1455 = vmatmul.mubr.msk.f32.vlgmr.msra.gmra.mrb[0].mxu0 %vm92_vm0, %v12_v25 }
   0xe   :  { %1519 = vmatmul.mubr.msk.f32.vlgmr.msra.gmra.mrb[0].mxu1 %vm92_vm0, %v12_v25  ;;  %355 = vmatprep.mubr.f32.mxu0 %v1627_v7 }
   0xf   :  { %804 = vmatprep.mubr.f32.mxu1 %v1627_v7 }
  0x11   :  { %1456 = vmatmul.mubr.msk.f32.gmra.mrb[2].mxu0 %vm92_vm0, %v13_v26 }
  0x12   :  { %1520 = vmatmul.mubr.msk.f32.gmra.mrb[2].mxu1 %vm92_vm0, %v13_v26  ;;  %361 = vmatprep.mubr.f32.mxu0 %v1627_v7 }
  0x13   :  { %7 = vsyncpa [#allocation3], 0  ;;  %810 = vmatprep.mubr.f32.mxu1 %v1627_v7  ;;  %v15_v28 = vld [vmem:[%s2154_s0 + $0x18] sm:$0xff]  ;;  %v16_v29 = vld [vmem:[%s2154_s0 + $0x20] sm:$0xff] }
  0x14   :  { %v17_v30 = vld [vmem:[%s2154_s0 + $0x28] sm:$0xff]  ;;  %v18_v31 = vld [vmem:[%s2154_s0 + $0x30] sm:$0xff]  ;;  %v19_v32 = vld [vmem:[%s2154_s0 + $0x38] sm:$0xff] }
  0x15   :  { %1457 = vmatmul.mubr.msk.f32.gmra.mrb[4].mxu0 %vm92_vm0, %v14_v27  ;;  %v20_v33 = vld [vmem:[%s2154_s0 + $0x40] sm:$0xff]  ;;  %v21_v34 = vld [vmem:[%s2154_s0 + $0x48] sm:$0xff]  ;;  %v22_v35 = vld [vmem:[%s2154_s0 + $0x50] sm:$0xff] }
  0x16   :  { %1521 = vmatmul.mubr.msk.f32.gmra.mrb[4].mxu1 %vm92_vm0, %v14_v27  ;;  %367 = vmatprep.mubr.f32.mxu0 %v1627_v7  ;;  %v23_v36 = vld [vmem:[%s2154_s0 + $0x58] sm:$0xff]  ;;  %v24_v37 = vld [vmem:[%s2154_s0 + $0x60] sm:$0xff]  ;;  %v25_v38 = vld [vmem:[%s2154_s0 + $0x68] sm:$0xff] }
  0x17   :  { %816 = vmatprep.mubr.f32.mxu1 %v1627_v7  ;;  %v26_v39 = vld [vmem:[%s2154_s0 + $0x70] sm:$0xff]  ;;  %v27_v40 = vld [vmem:[%s2154_s0 + $0x78] sm:$0xff]  ;;  %v28_v41 = vld [vmem:[%s2154_s0 + $0x80] sm:$0xff] }
  0x18   :  { %v29_v42 = vld [vmem:[%s2154_s0 + $0x88] sm:$0xff]  ;;  %v30_v43 = vld [vmem:[%s2154_s0 + $0x90] sm:$0xff]  ;;  %v31_v44 = vld [vmem:[%s2154_s0 + $0x98] sm:$0xff] }
  0x19   :  { %1458 = vmatmul.mubr.msk.f32.gmra.mrb[6].mxu0 %vm92_vm0, %v15_v28  ;;  %v32_v45 = vld [vmem:[%s2154_s0 + $0xa0] sm:$0xff]  ;;  %v33_v46 = vld [vmem:[%s2154_s0 + $0xa8] sm:$0xff]  ;;  %v34_v47 = vld [vmem:[%s2154_s0 + $0xb0] sm:$0xff] }
  0x1a   :  { %1522 = vmatmul.mubr.msk.f32.gmra.mrb[6].mxu1 %vm92_vm0, %v15_v28  ;;  %373 = vmatprep.mubr.f32.mxu0 %v1627_v7  ;;  %v35_v48 = vld [vmem:[%s2154_s0 + $0xb8] sm:$0xff]  ;;  %v36_v49 = vld [vmem:[%s2154_s0 + $0xc0] sm:$0xff]  ;;  %v37_v50 = vld [vmem:[%s2154_s0 + $0xc8] sm:$0xff] }
  0x1b   :  { %822 = vmatprep.mubr.f32.mxu1 %v1627_v7  ;;  %v38_v51 = vld [vmem:[%s2154_s0 + $0xd0] sm:$0xff]  ;;  %v39_v52 = vld [vmem:[%s2154_s0 + $0xd8] sm:$0xff]  ;;  %v40_v53 = vld [vmem:[%s2154_s0 + $0xe0] sm:$0xff] }
  0x1c   :  { %v41_v54 = vld [vmem:[%s2154_s0 + $0xe8] sm:$0xff]  ;;  %v42_v55 = vld [vmem:[%s2154_s0 + $0xf0] sm:$0xff]  ;;  %v43_v56 = vld [vmem:[%s2154_s0 + $0xf8] sm:$0xff] }
  0x1d   :  { %1459 = vmatmul.mubr.msk.f32.gmra.mrb[8].mxu0 %vm92_vm0, %v16_v29  ;;  %v44_v57 = vld [vmem:[%s2154_s0 + $0x100] sm:$0xff]  ;;  %v45_v58 = vld [vmem:[%s2154_s0 + $0x108] sm:$0xff]  ;;  %v46_v59 = vld [vmem:[%s2154_s0 + $0x110] sm:$0xff] }
  0x1e   :  { %1523 = vmatmul.mubr.msk.f32.gmra.mrb[8].mxu1 %vm92_vm0, %v16_v29  ;;  %379 = vmatprep.mubr.f32.mxu0 %v1627_v7  ;;  %v47_v60 = vld [vmem:[%s2154_s0 + $0x118] sm:$0xff]  ;;  %v48_v61 = vld [vmem:[%s2154_s0 + $0x120] sm:$0xff]  ;;  %v49_v62 = vld [vmem:[%s2154_s0 + $0x128] sm:$0xff] }
  0x1f   :  { %828 = vmatprep.mubr.f32.mxu1 %v1627_v7  ;;  %v50_v63 = vld [vmem:[%s2154_s0 + $0x130] sm:$0xff]  ;;  %v51_v0 = vld [vmem:[%s2154_s0 + $0x138] sm:$0xff]  ;;  %v52_v1 = vld [vmem:[%s2154_s0 + $0x140] sm:$0xff] }
  0x20   :  { %v53_v2 = vld [vmem:[%s2154_s0 + $0x148] sm:$0xff]  ;;  %v54_v3 = vld [vmem:[%s2154_s0 + $0x150] sm:$0xff]  ;;  %v55_v4 = vld [vmem:[%s2154_s0 + $0x158] sm:$0xff] }
  0x21   :  { %1460 = vmatmul.mubr.msk.f32.gmra.mrb[10].mxu0 %vm92_vm0, %v17_v30  ;;  %v56_v5 = vld [vmem:[%s2154_s0 + $0x160] sm:$0xff]  ;;  %v57_v6 = vld [vmem:[%s2154_s0 + $0x168] sm:$0xff]  ;;  %v58_v8 = vld [vmem:[%s2154_s0 + $0x170] sm:$0xff] }
  0x22   :  { %1524 = vmatmul.mubr.msk.f32.gmra.mrb[10].mxu1 %vm92_vm0, %v17_v30  ;;  %385 = vmatprep.mubr.f32.mxu0 %v1627_v7  ;;  %v59_v9 = vld [vmem:[%s2154_s0 + $0x178] sm:$0xff]  ;;  %v60_v10 = vld [vmem:[%s2154_s0 + $0x180] sm:$0xff]  ;;  %v61_v11 = vld [vmem:[%s2154_s0 + $0x188] sm:$0xff] }
  0x23   :  { %834 = vmatprep.mubr.f32.mxu1 %v1627_v7  ;;  %v62_v12 = vld [vmem:[%s2154_s0 + $0x190] sm:$0xff]  ;;  %v63_v13 = vld [vmem:[%s2154_s0 + $0x198] sm:$0xff]  ;;  %v64_v14 = vld [vmem:[%s2154_s0 + $0x1a0] sm:$0xff] }
  0x24   :  { %v65_v15 = vld [vmem:[%s2154_s0 + $0x1a8] sm:$0xff]  ;;  %v66_v20 = vld [vmem:[%s2154_s0 + $0x1b0] sm:$0xff]  ;;  %v67_v25 = vld [vmem:[%s2154_s0 + $0x1b8] sm:$0xff] }
  0x25   :  { %1461 = vmatmul.mubr.msk.f32.gmra.mrb[12].mxu0 %vm92_vm0, %v18_v31  ;;  %v68_v30 = vld [vmem:[%s2154_s0 + $0x1c0] sm:$0xff] }
  0x26   :  { %1525 = vmatmul.mubr.msk.f32.gmra.mrb[12].mxu1 %vm92_vm0, %v18_v31  ;;  %391 = vmatprep.mubr.f32.mxu0 %v1627_v7 }
  0x27   :  { %840 = vmatprep.mubr.f32.mxu1 %v1627_v7 }
  0x29   :  { %1462 = vmatmul.mubr.msk.f32.gmra.mrb[14].mxu0 %vm92_vm0, %v19_v32 }
  0x2a   :  { %1526 = vmatmul.mubr.msk.f32.gmra.mrb[14].mxu1 %vm92_vm0, %v19_v32  ;;  %397 = vmatprep.mubr.f32.mxu0 %v1627_v7 }
  0x2b   :  { %846 = vmatprep.mubr.f32.mxu1 %v1627_v7 }
  0x2d   :  { %1463 = vmatmul.mubr.msk.f32.gmra.mrb[16].mxu0 %vm92_vm0, %v20_v33 }
  0x2e   :  { %1527 = vmatmul.mubr.msk.f32.gmra.mrb[16].mxu1 %vm92_vm0, %v20_v33  ;;  %403 = vmatprep.mubr.f32.mxu0 %v1627_v7 }
  0x2f   :  { %852 = vmatprep.mubr.f32.mxu1 %v1627_v7 }
  0x31   :  { %1464 = vmatmul.mubr.msk.f32.gmra.mrb[18].mxu0 %vm92_vm0, %v21_v34 }
  0x32   :  { %1528 = vmatmul.mubr.msk.f32.gmra.mrb[18].mxu1 %vm92_vm0, %v21_v34  ;;  %409 = vmatprep.mubr.f32.mxu0 %v1627_v7 }
  0x33   :  { %858 = vmatprep.mubr.f32.mxu1 %v1627_v7 }
  0x35   :  { %1465 = vmatmul.mubr.msk.f32.gmra.mrb[20].mxu0 %vm92_vm0, %v22_v35 }
  0x36   :  { %1529 = vmatmul.mubr.msk.f32.gmra.mrb[20].mxu1 %vm92_vm0, %v22_v35  ;;  %415 = vmatprep.mubr.f32.mxu0 %v1627_v7  ;;  %v69_v35 = vld [vmem:[%s2154_s0 + $0x1c8] sm:$0xff] }
  0x37   :  { %864 = vmatprep.mubr.f32.mxu1 %v1627_v7 }
  0x39   :  { %1466 = vmatmul.mubr.msk.f32.gmra.mrb[22].mxu0 %vm92_vm0, %v23_v36 }
  0x3a   :  { %1530 = vmatmul.mubr.msk.f32.gmra.mrb[22].mxu1 %vm92_vm0, %v23_v36  ;;  %421 = vmatprep.mubr.f32.mxu0 %v1627_v7 }
  0x3b   :  { %870 = vmatprep.mubr.f32.mxu1 %v1627_v7 }
  0x3d   :  { %1467 = vmatmul.mubr.msk.f32.gmra.mrb[24].mxu0 %vm92_vm0, %v24_v37 }
  0x3e   :  { %1531 = vmatmul.mubr.msk.f32.gmra.mrb[24].mxu1 %vm92_vm0, %v24_v37  ;;  %427 = vmatprep.mubr.f32.mxu0 %v1627_v7 }
  0x3f   :  { %876 = vmatprep.mubr.f32.mxu1 %v1627_v7 }
  0x41   :  { %1468 = vmatmul.mubr.msk.f32.gmra.mrb[26].mxu0 %vm92_vm0, %v25_v38 }
  0x42   :  { %1532 = vmatmul.mubr.msk.f32.gmra.mrb[26].mxu1 %vm92_vm0, %v25_v38  ;;  %433 = vmatprep.mubr.f32.mxu0 %v1627_v7 }
  0x43   :  { %882 = vmatprep.mubr.f32.mxu1 %v1627_v7 }
  0x45   :  { %1469 = vmatmul.mubr.msk.f32.gmra.mrb[28].mxu0 %vm92_vm0, %v26_v39 }
  0x46   :  { %1533 = vmatmul.mubr.msk.f32.gmra.mrb[28].mxu1 %vm92_vm0, %v26_v39  ;;  %439 = vmatprep.mubr.f32.mxu0 %v1627_v7 }
  0x47   :  { %888 = vmatprep.mubr.f32.mxu1 %v1627_v7 }
  0x49   :  { %1470 = vmatmul.mubr.msk.f32.gmra.mrb[30].mxu0 %vm92_vm0, %v27_v40 }
  0x4a   :  { %1534 = vmatmul.mubr.msk.f32.gmra.mrb[30].mxu1 %vm92_vm0, %v27_v40  ;;  %445 = vmatprep.mubr.f32.mxu0 %v1627_v7  ;;  %v70_v40 = vld [vmem:[%s2154_s0 + $0x1d0] sm:$0xff] }
  0x4b   :  { %894 = vmatprep.mubr.f32.mxu1 %v1627_v7 }
  0x4d   :  { %1471 = vmatmul.mubr.msk.f32.gmra.mrb[32].mxu0 %vm92_vm0, %v28_v41 }
  0x4e   :  { %1535 = vmatmul.mubr.msk.f32.gmra.mrb[32].mxu1 %vm92_vm0, %v28_v41  ;;  %451 = vmatprep.mubr.f32.mxu0 %v1627_v7 }
  0x4f   :  { %900 = vmatprep.mubr.f32.mxu1 %v1627_v7 }
  0x51   :  { %1472 = vmatmul.mubr.msk.f32.gmra.mrb[34].mxu0 %vm92_vm0, %v29_v42 }
  0x52   :  { %1536 = vmatmul.mubr.msk.f32.gmra.mrb[34].mxu1 %vm92_vm0, %v29_v42  ;;  %457 = vmatprep.mubr.f32.mxu0 %v1627_v7 }
  0x53   :  { %906 = vmatprep.mubr.f32.mxu1 %v1627_v7 }
  0x55   :  { %1473 = vmatmul.mubr.msk.f32.gmra.mrb[36].mxu0 %vm92_vm0, %v30_v43 }
  0x56   :  { %1537 = vmatmul.mubr.msk.f32.gmra.mrb[36].mxu1 %vm92_vm0, %v30_v43  ;;  %463 = vmatprep.mubr.f32.mxu0 %v1627_v7 }
  0x57   :  { %912 = vmatprep.mubr.f32.mxu1 %v1627_v7 }
  0x59   :  { %1474 = vmatmul.mubr.msk.f32.gmra.mrb[38].mxu0 %vm92_vm0, %v31_v44 }
  0x5a   :  { %1538 = vmatmul.mubr.msk.f32.gmra.mrb[38].mxu1 %vm92_vm0, %v31_v44  ;;  %469 = vmatprep.mubr.f32.mxu0 %v1627_v7 }
  0x5b   :  { %918 = vmatprep.mubr.f32.mxu1 %v1627_v7 }
  0x5d   :  { %1475 = vmatmul.mubr.msk.f32.gmra.mrb[40].mxu0 %vm92_vm0, %v32_v45 }
  0x5e   :  { %1539 = vmatmul.mubr.msk.f32.gmra.mrb[40].mxu1 %vm92_vm0, %v32_v45  ;;  %475 = vmatprep.mubr.f32.mxu0 %v1627_v7  ;;  %v71_v45 = vld [vmem:[%s2154_s0 + $0x1d8] sm:$0xff] }
  0x5f   :  { %924 = vmatprep.mubr.f32.mxu1 %v1627_v7 }
  0x61   :  { %1476 = vmatmul.mubr.msk.f32.gmra.mrb[42].mxu0 %vm92_vm0, %v33_v46 }
  0x62   :  { %1540 = vmatmul.mubr.msk.f32.gmra.mrb[42].mxu1 %vm92_vm0, %v33_v46  ;;  %481 = vmatprep.mubr.f32.mxu0 %v1627_v7 }
  0x63   :  { %930 = vmatprep.mubr.f32.mxu1 %v1627_v7 }
  0x65   :  { %1477 = vmatmul.mubr.msk.f32.gmra.mrb[44].mxu0 %vm92_vm0, %v34_v47 }
  0x66   :  { %1541 = vmatmul.mubr.msk.f32.gmra.mrb[44].mxu1 %vm92_vm0, %v34_v47  ;;  %487 = vmatprep.mubr.f32.mxu0 %v1627_v7 }
  0x67   :  { %936 = vmatprep.mubr.f32.mxu1 %v1627_v7 }
  0x69   :  { %1478 = vmatmul.mubr.msk.f32.gmra.mrb[46].mxu0 %vm92_vm0, %v35_v48 }
  0x6a   :  { %1542 = vmatmul.mubr.msk.f32.gmra.mrb[46].mxu1 %vm92_vm0, %v35_v48  ;;  %493 = vmatprep.mubr.f32.mxu0 %v1627_v7 }
  0x6b   :  { %942 = vmatprep.mubr.f32.mxu1 %v1627_v7 }
  0x6d   :  { %1479 = vmatmul.mubr.msk.f32.gmra.mrb[48].mxu0 %vm92_vm0, %v36_v49 }
  0x6e   :  { %1543 = vmatmul.mubr.msk.f32.gmra.mrb[48].mxu1 %vm92_vm0, %v36_v49  ;;  %499 = vmatprep.mubr.f32.mxu0 %v1627_v7 }
  0x6f   :  { %948 = vmatprep.mubr.f32.mxu1 %v1627_v7 }
  0x71   :  { %1480 = vmatmul.mubr.msk.f32.gmra.mrb[50].mxu0 %vm92_vm0, %v37_v50 }
  0x72   :  { %1544 = vmatmul.mubr.msk.f32.gmra.mrb[50].mxu1 %vm92_vm0, %v37_v50  ;;  %505 = vmatprep.mubr.f32.mxu0 %v1627_v7  ;;  %v72_v50 = vld [vmem:[%s2154_s0 + $0x1e0] sm:$0xff] }
  0x73   :  { %954 = vmatprep.mubr.f32.mxu1 %v1627_v7 }
  0x75   :  { %1481 = vmatmul.mubr.msk.f32.gmra.mrb[52].mxu0 %vm92_vm0, %v38_v51 }
  0x76   :  { %1545 = vmatmul.mubr.msk.f32.gmra.mrb[52].mxu1 %vm92_vm0, %v38_v51  ;;  %511 = vmatprep.mubr.f32.mxu0 %v1627_v7 }
  0x77   :  { %960 = vmatprep.mubr.f32.mxu1 %v1627_v7 }
  0x79   :  { %1482 = vmatmul.mubr.msk.f32.gmra.mrb[54].mxu0 %vm92_vm0, %v39_v52 }
  0x7a   :  { %1546 = vmatmul.mubr.msk.f32.gmra.mrb[54].mxu1 %vm92_vm0, %v39_v52  ;;  %517 = vmatprep.mubr.f32.mxu0 %v1627_v7 }
  0x7b   :  { %966 = vmatprep.mubr.f32.mxu1 %v1627_v7 }
  0x7d   :  { %1483 = vmatmul.mubr.msk.f32.gmra.mrb[56].mxu0 %vm92_vm0, %v40_v53 }
  0x7e   :  { %1547 = vmatmul.mubr.msk.f32.gmra.mrb[56].mxu1 %vm92_vm0, %v40_v53  ;;  %523 = vmatprep.mubr.f32.mxu0 %v1627_v7 }
  0x7f   :  { %972 = vmatprep.mubr.f32.mxu1 %v1627_v7 }
  0x81   :  { %1484 = vmatmul.mubr.msk.f32.gmra.mrb[58].mxu0 %vm92_vm0, %v41_v54 }
  0x82   :  { %1548 = vmatmul.mubr.msk.f32.gmra.mrb[58].mxu1 %vm92_vm0, %v41_v54  ;;  %529 = vmatprep.mubr.f32.mxu0 %v1627_v7 }
  0x83   :  { %978 = vmatprep.mubr.f32.mxu1 %v1627_v7 }
  0x85   :  { %1485 = vmatmul.mubr.msk.f32.gmra.mrb[60].mxu0 %vm92_vm0, %v42_v55 }
  0x86   :  { %1549 = vmatmul.mubr.msk.f32.gmra.mrb[60].mxu1 %vm92_vm0, %v42_v55  ;;  %535 = vmatprep.mubr.f32.mxu0 %v1627_v7  ;;  %v73_v55 = vld [vmem:[%s2154_s0 + $0x1e8] sm:$0xff] }
  0x87   :  { %984 = vmatprep.mubr.f32.mxu1 %v1627_v7 }
  0x89   :  { %1486 = vmatmul.mubr.msk.f32.gmra.mrb[62].mxu0 %vm92_vm0, %v43_v56 }
  0x8a   :  { %1550 = vmatmul.mubr.msk.f32.gmra.mrb[62].mxu1 %vm92_vm0, %v43_v56  ;;  %541 = vmatprep.mubr.f32.mxu0 %v1627_v7 }
  0x8b   :  { %990 = vmatprep.mubr.f32.mxu1 %v1627_v7 }
  0x8d   :  { %1487 = vmatmul.mubr.msk.f32.gmra.mrb[64].mxu0 %vm92_vm0, %v44_v57 }
  0x8e   :  { %1551 = vmatmul.mubr.msk.f32.gmra.mrb[64].mxu1 %vm92_vm0, %v44_v57  ;;  %547 = vmatprep.mubr.f32.mxu0 %v1627_v7 }
  0x8f   :  { %996 = vmatprep.mubr.f32.mxu1 %v1627_v7 }
  0x91   :  { %1488 = vmatmul.mubr.msk.f32.gmra.mrb[66].mxu0 %vm92_vm0, %v45_v58 }
  0x92   :  { %1552 = vmatmul.mubr.msk.f32.gmra.mrb[66].mxu1 %vm92_vm0, %v45_v58  ;;  %553 = vmatprep.mubr.f32.mxu0 %v1627_v7 }
  0x93   :  { %1002 = vmatprep.mubr.f32.mxu1 %v1627_v7 }
  0x95   :  { %1489 = vmatmul.mubr.msk.f32.gmra.mrb[68].mxu0 %vm92_vm0, %v46_v59 }
  0x96   :  { %1553 = vmatmul.mubr.msk.f32.gmra.mrb[68].mxu1 %vm92_vm0, %v46_v59  ;;  %559 = vmatprep.mubr.f32.mxu0 %v1627_v7 }
  0x97   :  { %1008 = vmatprep.mubr.f32.mxu1 %v1627_v7 }
  0x99   :  { %1490 = vmatmul.mubr.msk.f32.gmra.mrb[70].mxu0 %vm92_vm0, %v47_v60 }
  0x9a   :  { %1554 = vmatmul.mubr.msk.f32.gmra.mrb[70].mxu1 %vm92_vm0, %v47_v60  ;;  %565 = vmatprep.mubr.f32.mxu0 %v1627_v7  ;;  %v74_v60 = vld [vmem:[%s2154_s0 + $0x1f0] sm:$0xff] }
  0x9b   :  { %1014 = vmatprep.mubr.f32.mxu1 %v1627_v7 }
  0x9d   :  { %1491 = vmatmul.mubr.msk.f32.gmra.mrb[72].mxu0 %vm92_vm0, %v48_v61 }
  0x9e   :  { %1555 = vmatmul.mubr.msk.f32.gmra.mrb[72].mxu1 %vm92_vm0, %v48_v61  ;;  %571 = vmatprep.mubr.f32.mxu0 %v1627_v7 }
  0x9f   :  { %1020 = vmatprep.mubr.f32.mxu1 %v1627_v7 }
  0xa1   :  { %1492 = vmatmul.mubr.msk.f32.gmra.mrb[74].mxu0 %vm92_vm0, %v49_v62 }
  0xa2   :  { %1556 = vmatmul.mubr.msk.f32.gmra.mrb[74].mxu1 %vm92_vm0, %v49_v62  ;;  %577 = vmatprep.mubr.f32.mxu0 %v1627_v7 }
  0xa3   :  { %1026 = vmatprep.mubr.f32.mxu1 %v1627_v7 }
  0xa5   :  { %1493 = vmatmul.mubr.msk.f32.gmra.mrb[76].mxu0 %vm92_vm0, %v50_v63 }
  0xa6   :  { %1557 = vmatmul.mubr.msk.f32.gmra.mrb[76].mxu1 %vm92_vm0, %v50_v63  ;;  %583 = vmatprep.mubr.f32.mxu0 %v1627_v7 }
  0xa7   :  { %1032 = vmatprep.mubr.f32.mxu1 %v1627_v7 }
  0xa9   :  { %1494 = vmatmul.mubr.msk.f32.gmra.mrb[78].mxu0 %vm92_vm0, %v51_v0 }
  0xaa   :  { %1558 = vmatmul.mubr.msk.f32.gmra.mrb[78].mxu1 %vm92_vm0, %v51_v0  ;;  %589 = vmatprep.mubr.f32.mxu0 %v1627_v7 }
  0xab   :  { %1038 = vmatprep.mubr.f32.mxu1 %v1627_v7 }
  0xad   :  { %1495 = vmatmul.mubr.msk.f32.gmra.mrb[80].mxu0 %vm92_vm0, %v52_v1 }
  0xae   :  { %1559 = vmatmul.mubr.msk.f32.gmra.mrb[80].mxu1 %vm92_vm0, %v52_v1  ;;  %595 = vmatprep.mubr.f32.mxu0 %v1627_v7  ;;  %v75_v1 = vld [vmem:[%s2154_s0 + $0x1f8] sm:$0xff]  ;;  %s1628_s0 = smov [#allocation2]  }
  0xaf   :  { %1044 = vmatprep.mubr.f32.mxu1 %v1627_v7  ;;  %s1444_s24 = sshll.u32 %s1628_s0, 4  ;;  %s1445_s24 = int_to_ptr.vmem [resolvable:$true] %s1444_s24 }
  0xb0   :  { %s1603_s25 = scalar_lea.vmem %s1445_s24, 32768  ;;  %p1608_p1 = scmp.lt.s32.totalorder %s1445_s24, %s1445_s24 }
  0xb1   :  { %1496 = vmatmul.mubr.msk.f32.gmra.mrb[82].mxu0 %vm92_vm0, %v53_v2  ;;  %p1604_p0 = scmp.ne.s32.totalorder %s1445_s24, %s1603_s25  ;;  %p1609_p2 = scmp.lt.s32.totalorder %s1603_s25, %s1603_s25 }
  0xb2   :  { %1560 = vmatmul.mubr.msk.f32.gmra.mrb[82].mxu1 %vm92_vm0, %v53_v2  ;;  %601 = vmatprep.mubr.f32.mxu0 %v1627_v7 }
  0xb3   :  { %1050 = vmatprep.mubr.f32.mxu1 %v1627_v7  ;;  %p1610_p3 = por %p1609_p2, %p1608_p1 }
  0xb5   :  { %1497 = vmatmul.mubr.msk.f32.gmra.mrb[84].mxu0 %vm92_vm0, %v54_v3  ;;  %p1611_p4 = pnand %p1610_p3, %p1604_p0 }
  0xb6   :  { %1561 = vmatmul.mubr.msk.f32.gmra.mrb[84].mxu1 %vm92_vm0, %v54_v3  ;;  %607 = vmatprep.mubr.f32.mxu0 %v1627_v7 }
  0xb7   :  { %1056 = vmatprep.mubr.f32.mxu1 %v1627_v7 }
  0xb9   :  { %1498 = vmatmul.mubr.msk.f32.gmra.mrb[86].mxu0 %vm92_vm0, %v55_v4 }
  0xba   :  { %1562 = vmatmul.mubr.msk.f32.gmra.mrb[86].mxu1 %vm92_vm0, %v55_v4  ;;  %613 = vmatprep.mubr.f32.mxu0 %v1627_v7 }
  0xbb   :  { %1062 = vmatprep.mubr.f32.mxu1 %v1627_v7 }
  0xbd   :  { %1499 = vmatmul.mubr.msk.f32.gmra.mrb[88].mxu0 %vm92_vm0, %v56_v5 }
  0xbe   :  { %1563 = vmatmul.mubr.msk.f32.gmra.mrb[88].mxu1 %vm92_vm0, %v56_v5  ;;  %619 = vmatprep.mubr.f32.mxu0 %v1627_v7 }
  0xbf   :  { %1068 = vmatprep.mubr.f32.mxu1 %v1627_v7 }
  0xc1   :  { %1500 = vmatmul.mubr.msk.f32.gmra.mrb[90].mxu0 %vm92_vm0, %v57_v6 }
  0xc2   :  { %1564 = vmatmul.mubr.msk.f32.gmra.mrb[90].mxu1 %vm92_vm0, %v57_v6  ;;  %625 = vmatprep.mubr.f32.mxu0 %v1627_v7 }
  0xc3   :  { %1074 = vmatprep.mubr.f32.mxu1 %v1627_v7 }
  0xc5   :  { %1501 = vmatmul.mubr.msk.f32.gmra.mrb[92].mxu0 %vm92_vm0, %v58_v8 }
  0xc6   :  { %1565 = vmatmul.mubr.msk.f32.gmra.mrb[92].mxu1 %vm92_vm0, %v58_v8  ;;  %631 = vmatprep.mubr.f32.mxu0 %v1627_v7 }
  0xc7   :  { %1080 = vmatprep.mubr.f32.mxu1 %v1627_v7 }
  0xc9   :  { %1502 = vmatmul.mubr.msk.f32.gmra.mrb[94].mxu0 %vm92_vm0, %v59_v9 }
  0xca   :  { %1566 = vmatmul.mubr.msk.f32.gmra.mrb[94].mxu1 %vm92_vm0, %v59_v9  ;;  %637 = vmatprep.mubr.f32.mxu0 %v1627_v7 }
  0xcb   :  { %1086 = vmatprep.mubr.f32.mxu1 %v1627_v7 }
  0xcd   :  { %1503 = vmatmul.mubr.msk.f32.gmra.mrb[96].mxu0 %vm92_vm0, %v60_v10 }
  0xce   :  { %1567 = vmatmul.mubr.msk.f32.gmra.mrb[96].mxu1 %vm92_vm0, %v60_v10  ;;  %643 = vmatprep.mubr.f32.mxu0 %v1627_v7 }
  0xcf   :  { %1092 = vmatprep.mubr.f32.mxu1 %v1627_v7 }
  0xd1   :  { %1504 = vmatmul.mubr.msk.f32.gmra.mrb[98].mxu0 %vm92_vm0, %v61_v11 }
  0xd2   :  { %1568 = vmatmul.mubr.msk.f32.gmra.mrb[98].mxu1 %vm92_vm0, %v61_v11  ;;  %649 = vmatprep.mubr.f32.mxu0 %v1627_v7 }
  0xd3   :  { %1098 = vmatprep.mubr.f32.mxu1 %v1627_v7 }
  0xd5   :  { %1505 = vmatmul.mubr.msk.f32.gmra.mrb[100].mxu0 %vm92_vm0, %v62_v12 }
  0xd6   :  { %1569 = vmatmul.mubr.msk.f32.gmra.mrb[100].mxu1 %vm92_vm0, %v62_v12  ;;  %655 = vmatprep.mubr.f32.mxu0 %v1627_v7 }
  0xd7   :  { %1104 = vmatprep.mubr.f32.mxu1 %v1627_v7 }
  0xd9   :  { %1506 = vmatmul.mubr.msk.f32.gmra.mrb[102].mxu0 %vm92_vm0, %v63_v13 }
  0xda   :  { %1570 = vmatmul.mubr.msk.f32.gmra.mrb[102].mxu1 %vm92_vm0, %v63_v13  ;;  %661 = vmatprep.mubr.f32.mxu0 %v1627_v7 }
  0xdb   :  { %1110 = vmatprep.mubr.f32.mxu1 %v1627_v7 }
  0xdd   :  { %1507 = vmatmul.mubr.msk.f32.gmra.mrb[104].mxu0 %vm92_vm0, %v64_v14 }
  0xde   :  { %1571 = vmatmul.mubr.msk.f32.gmra.mrb[104].mxu1 %vm92_vm0, %v64_v14  ;;  %667 = vmatprep.mubr.f32.mxu0 %v1627_v7 }
  0xdf   :  { %1116 = vmatprep.mubr.f32.mxu1 %v1627_v7 }
  0xe0   :  { %v351_v16 = vpop.f32.mrb[0].mxu0 }
  0xe1   :  { %1183 = vst [vmem:[#allocation2] sm:$0xff] %v351_v16  ;;  %v800_v17 = vpop.f32.mrb[0].mxu1  ;;  %v353_v18 = vpop.f32.mrb[1].mxu0  ;;  %1508 = vmatmul.mubr.msk.f32.gmra.mrb[106].mxu0 %vm92_vm0, %v65_v15 }
  0xe2   :  { %1185 = vst [vmem:[#allocation2 + $0x10] sm:$0xff] %v800_v17  ;;  %1184 = vst [vmem:[#allocation2 + $0x8] sm:$0xff] %v353_v18  ;;  %v802_v19 = vpop.f32.mrb[1].mxu1  ;;  %1572 = vmatmul.mubr.msk.f32.gmra.mrb[106].mxu1 %vm92_vm0, %v65_v15  ;;  %673 = vmatprep.mubr.f32.mxu0 %v1627_v7 }
  0xe3   :  { %1186 = vst [vmem:[#allocation2 + $0x18] sm:$0xff] %v802_v19  ;;  %1122 = vmatprep.mubr.f32.mxu1 %v1627_v7 }
  0xe4   :  { %v357_v21 = vpop.f32.mrb[2].mxu0 }
  0xe5   :  { %1187 = vst [vmem:[#allocation2 + $0x20] sm:$0xff] %v357_v21  ;;  %v806_v22 = vpop.f32.mrb[2].mxu1  ;;  %v359_v23 = vpop.f32.mrb[3].mxu0  ;;  %1509 = vmatmul.mubr.msk.f32.gmra.mrb[108].mxu0 %vm92_vm0, %v66_v20 }
  0xe6   :  { %1189 = vst [vmem:[#allocation2 + $0x30] sm:$0xff] %v806_v22  ;;  %1188 = vst [vmem:[#allocation2 + $0x28] sm:$0xff] %v359_v23  ;;  %v808_v24 = vpop.f32.mrb[3].mxu1  ;;  %1573 = vmatmul.mubr.msk.f32.gmra.mrb[108].mxu1 %vm92_vm0, %v66_v20  ;;  %679 = vmatprep.mubr.f32.mxu0 %v1627_v7 }
  0xe7   :  { %1190 = vst [vmem:[#allocation2 + $0x38] sm:$0xff] %v808_v24  ;;  %1128 = vmatprep.mubr.f32.mxu1 %v1627_v7 }
  0xe8   :  { %v363_v26 = vpop.f32.mrb[4].mxu0 }
  0xe9   :  { %1191 = vst [vmem:[#allocation2 + $0x40] sm:$0xff] %v363_v26  ;;  %v812_v27 = vpop.f32.mrb[4].mxu1  ;;  %v365_v28 = vpop.f32.mrb[5].mxu0  ;;  %1510 = vmatmul.mubr.msk.f32.gmra.mrb[110].mxu0 %vm92_vm0, %v67_v25 }
  0xea   :  { %1193 = vst [vmem:[#allocation2 + $0x50] sm:$0xff] %v812_v27  ;;  %1192 = vst [vmem:[#allocation2 + $0x48] sm:$0xff] %v365_v28  ;;  %v814_v29 = vpop.f32.mrb[5].mxu1  ;;  %1574 = vmatmul.mubr.msk.f32.gmra.mrb[110].mxu1 %vm92_vm0, %v67_v25  ;;  %685 = vmatprep.mubr.f32.mxu0 %v1627_v7 }
  0xeb   :  { %1194 = vst [vmem:[#allocation2 + $0x58] sm:$0xff] %v814_v29  ;;  %1134 = vmatprep.mubr.f32.mxu1 %v1627_v7 }
  0xec   :  { %v369_v31 = vpop.f32.mrb[6].mxu0 }
  0xed   :  { %1195 = vst [vmem:[#allocation2 + $0x60] sm:$0xff] %v369_v31  ;;  %v818_v32 = vpop.f32.mrb[6].mxu1  ;;  %v371_v33 = vpop.f32.mrb[7].mxu0  ;;  %1511 = vmatmul.mubr.msk.f32.gmra.mrb[112].mxu0 %vm92_vm0, %v68_v30 }
  0xee   :  { %1197 = vst [vmem:[#allocation2 + $0x70] sm:$0xff] %v818_v32  ;;  %1196 = vst [vmem:[#allocation2 + $0x68] sm:$0xff] %v371_v33  ;;  %v820_v34 = vpop.f32.mrb[7].mxu1  ;;  %1575 = vmatmul.mubr.msk.f32.gmra.mrb[112].mxu1 %vm92_vm0, %v68_v30  ;;  %691 = vmatprep.mubr.f32.mxu0 %v1627_v7 }
  0xef   :  { %1198 = vst [vmem:[#allocation2 + $0x78] sm:$0xff] %v820_v34  ;;  %1140 = vmatprep.mubr.f32.mxu1 %v1627_v7 }
  0xf0   :  { %v375_v36 = vpop.f32.mrb[8].mxu0 }
  0xf1   :  { %1199 = vst [vmem:[#allocation2 + $0x80] sm:$0xff] %v375_v36  ;;  %v824_v37 = vpop.f32.mrb[8].mxu1  ;;  %v377_v38 = vpop.f32.mrb[9].mxu0  ;;  %1512 = vmatmul.mubr.msk.f32.gmra.mrb[114].mxu0 %vm92_vm0, %v69_v35 }
  0xf2   :  { %1201 = vst [vmem:[#allocation2 + $0x90] sm:$0xff] %v824_v37  ;;  %1200 = vst [vmem:[#allocation2 + $0x88] sm:$0xff] %v377_v38  ;;  %v826_v39 = vpop.f32.mrb[9].mxu1  ;;  %1576 = vmatmul.mubr.msk.f32.gmra.mrb[114].mxu1 %vm92_vm0, %v69_v35  ;;  %697 = vmatprep.mubr.f32.mxu0 %v1627_v7 }
  0xf3   :  { %1202 = vst [vmem:[#allocation2 + $0x98] sm:$0xff] %v826_v39  ;;  %1146 = vmatprep.mubr.f32.mxu1 %v1627_v7 }
  0xf4   :  { %v381_v41 = vpop.f32.mrb[10].mxu0 }
  0xf5   :  { %1203 = vst [vmem:[#allocation2 + $0xa0] sm:$0xff] %v381_v41  ;;  %v830_v42 = vpop.f32.mrb[10].mxu1  ;;  %v383_v43 = vpop.f32.mrb[11].mxu0  ;;  %1513 = vmatmul.mubr.msk.f32.gmra.mrb[116].mxu0 %vm92_vm0, %v70_v40 }
  0xf6   :  { %1205 = vst [vmem:[#allocation2 + $0xb0] sm:$0xff] %v830_v42  ;;  %1204 = vst [vmem:[#allocation2 + $0xa8] sm:$0xff] %v383_v43  ;;  %v832_v44 = vpop.f32.mrb[11].mxu1  ;;  %1577 = vmatmul.mubr.msk.f32.gmra.mrb[116].mxu1 %vm92_vm0, %v70_v40  ;;  %703 = vmatprep.mubr.f32.mxu0 %v1627_v7 }
  0xf7   :  { %1206 = vst [vmem:[#allocation2 + $0xb8] sm:$0xff] %v832_v44  ;;  %1152 = vmatprep.mubr.f32.mxu1 %v1627_v7 }
  0xf8   :  { %v387_v46 = vpop.f32.mrb[12].mxu0 }
  0xf9   :  { %1207 = vst [vmem:[#allocation2 + $0xc0] sm:$0xff] %v387_v46  ;;  %v836_v47 = vpop.f32.mrb[12].mxu1  ;;  %v389_v48 = vpop.f32.mrb[13].mxu0  ;;  %1514 = vmatmul.mubr.msk.f32.gmra.mrb[118].mxu0 %vm92_vm0, %v71_v45 }
  0xfa   :  { %1209 = vst [vmem:[#allocation2 + $0xd0] sm:$0xff] %v836_v47  ;;  %1208 = vst [vmem:[#allocation2 + $0xc8] sm:$0xff] %v389_v48  ;;  %v838_v49 = vpop.f32.mrb[13].mxu1  ;;  %1578 = vmatmul.mubr.msk.f32.gmra.mrb[118].mxu1 %vm92_vm0, %v71_v45  ;;  %709 = vmatprep.mubr.f32.mxu0 %v1627_v7 }
  0xfb   :  { %1210 = vst [vmem:[#allocation2 + $0xd8] sm:$0xff] %v838_v49  ;;  %1158 = vmatprep.mubr.f32.mxu1 %v1627_v7 }
  0xfc   :  { %v393_v51 = vpop.f32.mrb[14].mxu0 }
  0xfd   :  { %1211 = vst [vmem:[#allocation2 + $0xe0] sm:$0xff] %v393_v51  ;;  %v842_v52 = vpop.f32.mrb[14].mxu1  ;;  %v395_v53 = vpop.f32.mrb[15].mxu0  ;;  %1515 = vmatmul.mubr.msk.f32.gmra.mrb[120].mxu0 %vm92_vm0, %v72_v50 }
  0xfe   :  { %1213 = vst [vmem:[#allocation2 + $0xf0] sm:$0xff] %v842_v52  ;;  %1212 = vst [vmem:[#allocation2 + $0xe8] sm:$0xff] %v395_v53  ;;  %v844_v54 = vpop.f32.mrb[15].mxu1  ;;  %1579 = vmatmul.mubr.msk.f32.gmra.mrb[120].mxu1 %vm92_vm0, %v72_v50  ;;  %715 = vmatprep.mubr.f32.mxu0 %v1627_v7 }
  0xff   :  { %1214 = vst [vmem:[#allocation2 + $0xf8] sm:$0xff] %v844_v54  ;;  %1164 = vmatprep.mubr.f32.mxu1 %v1627_v7 }
 0x100   :  { %v399_v56 = vpop.f32.mrb[16].mxu0 }
 0x101   :  { %1215 = vst [vmem:[#allocation2 + $0x100] sm:$0xff] %v399_v56  ;;  %v848_v57 = vpop.f32.mrb[16].mxu1  ;;  %v401_v58 = vpop.f32.mrb[17].mxu0  ;;  %1516 = vmatmul.mubr.msk.f32.gmra.mrb[122].mxu0 %vm92_vm0, %v73_v55 }
 0x102   :  { %1217 = vst [vmem:[#allocation2 + $0x110] sm:$0xff] %v848_v57  ;;  %1216 = vst [vmem:[#allocation2 + $0x108] sm:$0xff] %v401_v58  ;;  %v850_v59 = vpop.f32.mrb[17].mxu1  ;;  %1580 = vmatmul.mubr.msk.f32.gmra.mrb[122].mxu1 %vm92_vm0, %v73_v55  ;;  %721 = vmatprep.mubr.f32.mxu0 %v1627_v7 }
 0x103   :  { %1218 = vst [vmem:[#allocation2 + $0x118] sm:$0xff] %v850_v59  ;;  %1170 = vmatprep.mubr.f32.mxu1 %v1627_v7 }
 0x104   :  { %v405_v61 = vpop.f32.mrb[18].mxu0 }
 0x105   :  { %1219 = vst [vmem:[#allocation2 + $0x120] sm:$0xff] %v405_v61  ;;  %v854_v62 = vpop.f32.mrb[18].mxu1  ;;  %v407_v63 = vpop.f32.mrb[19].mxu0  ;;  %1517 = vmatmul.mubr.msk.f32.gmra.mrb[124].mxu0 %vm92_vm0, %v74_v60 }
 0x106   :  { %1221 = vst [vmem:[#allocation2 + $0x130] sm:$0xff] %v854_v62  ;;  %1220 = vst [vmem:[#allocation2 + $0x128] sm:$0xff] %v407_v63  ;;  %v856_v0 = vpop.f32.mrb[19].mxu1  ;;  %1581 = vmatmul.mubr.msk.f32.gmra.mrb[124].mxu1 %vm92_vm0, %v74_v60  ;;  %727 = vmatprep.mubr.f32.mxu0 %v1627_v7 }
 0x107   :  { %1222 = vst [vmem:[#allocation2 + $0x138] sm:$0xff] %v856_v0  ;;  %1176 = vmatprep.mubr.f32.mxu1 %v1627_v7 }
 0x108   :  { %v411_v2 = vpop.f32.mrb[20].mxu0 }
 0x109   :  { %1223 = vst [vmem:[#allocation2 + $0x140] sm:$0xff] %v411_v2  ;;  %v860_v3 = vpop.f32.mrb[20].mxu1  ;;  %v413_v4 = vpop.f32.mrb[21].mxu0  ;;  %1518 = vmatmul.mubr.msk.f32.gmra.mrb[126].mxu0 %vm92_vm0, %v75_v1 }
 0x10a   :  { %1225 = vst [vmem:[#allocation2 + $0x150] sm:$0xff] %v860_v3  ;;  %1224 = vst [vmem:[#allocation2 + $0x148] sm:$0xff] %v413_v4  ;;  %v862_v5 = vpop.f32.mrb[21].mxu1  ;;  %1582 = vmatmul.mubr.msk.f32.gmra.mrb[126].mxu1 %vm92_vm0, %v75_v1 }
 0x10b   :  { %1226 = vst [vmem:[#allocation2 + $0x158] sm:$0xff] %v862_v5 }
 0x10c   :  { %v417_v6 = vpop.f32.mrb[22].mxu0 }
 0x10d   :  { %1227 = vst [vmem:[#allocation2 + $0x160] sm:$0xff] %v417_v6  ;;  %v866_v8 = vpop.f32.mrb[22].mxu1  ;;  %v419_v9 = vpop.f32.mrb[23].mxu0 }
 0x10e   :  { %1229 = vst [vmem:[#allocation2 + $0x170] sm:$0xff] %v866_v8  ;;  %1228 = vst [vmem:[#allocation2 + $0x168] sm:$0xff] %v419_v9  ;;  %v868_v10 = vpop.f32.mrb[23].mxu1 }
 0x10f   :  { %1230 = vst [vmem:[#allocation2 + $0x178] sm:$0xff] %v868_v10 }
 0x110   :  { %v423_v7 = vpop.f32.mrb[24].mxu0 }
 0x111   :  { %1231 = vst [vmem:[#allocation2 + $0x180] sm:$0xff] %v423_v7  ;;  %v872_v11 = vpop.f32.mrb[24].mxu1  ;;  %v425_v12 = vpop.f32.mrb[25].mxu0 }
 0x112   :  { %1233 = vst [vmem:[#allocation2 + $0x190] sm:$0xff] %v872_v11  ;;  %1232 = vst [vmem:[#allocation2 + $0x188] sm:$0xff] %v425_v12  ;;  %v874_v13 = vpop.f32.mrb[25].mxu1 }
 0x113   :  { %1234 = vst [vmem:[#allocation2 + $0x198] sm:$0xff] %v874_v13 }
 0x114   :  { %v429_v14 = vpop.f32.mrb[26].mxu0 }
 0x115   :  { %1235 = vst [vmem:[#allocation2 + $0x1a0] sm:$0xff] %v429_v14  ;;  %v878_v15 = vpop.f32.mrb[26].mxu1  ;;  %v431_v16 = vpop.f32.mrb[27].mxu0 }
 0x116   :  { %1237 = vst [vmem:[#allocation2 + $0x1b0] sm:$0xff] %v878_v15  ;;  %1236 = vst [vmem:[#allocation2 + $0x1a8] sm:$0xff] %v431_v16  ;;  %v880_v17 = vpop.f32.mrb[27].mxu1 }
 0x117   :  { %1238 = vst [vmem:[#allocation2 + $0x1b8] sm:$0xff] %v880_v17 }
 0x118   :  { %v435_v18 = vpop.f32.mrb[28].mxu0 }
 0x119   :  { %1239 = vst [vmem:[#allocation2 + $0x1c0] sm:$0xff] %v435_v18  ;;  %v884_v19 = vpop.f32.mrb[28].mxu1  ;;  %v437_v20 = vpop.f32.mrb[29].mxu0 }
 0x11a   :  { %1241 = vst [vmem:[#allocation2 + $0x1d0] sm:$0xff] %v884_v19  ;;  %1240 = vst [vmem:[#allocation2 + $0x1c8] sm:$0xff] %v437_v20  ;;  %v886_v21 = vpop.f32.mrb[29].mxu1 }
 0x11b   :  { %1242 = vst [vmem:[#allocation2 + $0x1d8] sm:$0xff] %v886_v21 }
 0x11c   :  { %v441_v22 = vpop.f32.mrb[30].mxu0 }
 0x11d   :  { %1243 = vst [vmem:[#allocation2 + $0x1e0] sm:$0xff] %v441_v22  ;;  %v890_v23 = vpop.f32.mrb[30].mxu1  ;;  %v443_v24 = vpop.f32.mrb[31].mxu0 }
 0x11e   :  { %1245 = vst [vmem:[#allocation2 + $0x1f0] sm:$0xff] %v890_v23  ;;  %1244 = vst [vmem:[#allocation2 + $0x1e8] sm:$0xff] %v443_v24  ;;  %v892_v25 = vpop.f32.mrb[31].mxu1 }
 0x11f   :  { %1246 = vst [vmem:[#allocation2 + $0x1f8] sm:$0xff] %v892_v25 }
 0x120   :  { %v447_v26 = vpop.f32.mrb[32].mxu0 }
 0x121   :  { %1247 = vst [vmem:[#allocation2 + $0x200] sm:$0xff] %v447_v26  ;;  %v896_v27 = vpop.f32.mrb[32].mxu1  ;;  %v449_v28 = vpop.f32.mrb[33].mxu0 }
 0x122   :  { %1249 = vst [vmem:[#allocation2 + $0x210] sm:$0xff] %v896_v27  ;;  %1248 = vst [vmem:[#allocation2 + $0x208] sm:$0xff] %v449_v28  ;;  %v898_v29 = vpop.f32.mrb[33].mxu1 }
 0x123   :  { %1250 = vst [vmem:[#allocation2 + $0x218] sm:$0xff] %v898_v29 }
 0x124   :  { %v453_v30 = vpop.f32.mrb[34].mxu0 }
 0x125   :  { %1251 = vst [vmem:[#allocation2 + $0x220] sm:$0xff] %v453_v30  ;;  %v902_v31 = vpop.f32.mrb[34].mxu1  ;;  %v455_v32 = vpop.f32.mrb[35].mxu0 }
 0x126   :  { %1253 = vst [vmem:[#allocation2 + $0x230] sm:$0xff] %v902_v31  ;;  %1252 = vst [vmem:[#allocation2 + $0x228] sm:$0xff] %v455_v32  ;;  %v904_v33 = vpop.f32.mrb[35].mxu1 }
 0x127   :  { %1254 = vst [vmem:[#allocation2 + $0x238] sm:$0xff] %v904_v33 }
 0x128   :  { %v459_v34 = vpop.f32.mrb[36].mxu0 }
 0x129   :  { %1255 = vst [vmem:[#allocation2 + $0x240] sm:$0xff] %v459_v34  ;;  %v908_v35 = vpop.f32.mrb[36].mxu1  ;;  %v461_v36 = vpop.f32.mrb[37].mxu0 }
 0x12a   :  { %1257 = vst [vmem:[#allocation2 + $0x250] sm:$0xff] %v908_v35  ;;  %1256 = vst [vmem:[#allocation2 + $0x248] sm:$0xff] %v461_v36  ;;  %v910_v37 = vpop.f32.mrb[37].mxu1 }
 0x12b   :  { %1258 = vst [vmem:[#allocation2 + $0x258] sm:$0xff] %v910_v37 }
 0x12c   :  { %v465_v38 = vpop.f32.mrb[38].mxu0 }
 0x12d   :  { %1259 = vst [vmem:[#allocation2 + $0x260] sm:$0xff] %v465_v38  ;;  %v914_v39 = vpop.f32.mrb[38].mxu1  ;;  %v467_v40 = vpop.f32.mrb[39].mxu0 }
 0x12e   :  { %1261 = vst [vmem:[#allocation2 + $0x270] sm:$0xff] %v914_v39  ;;  %1260 = vst [vmem:[#allocation2 + $0x268] sm:$0xff] %v467_v40  ;;  %v916_v41 = vpop.f32.mrb[39].mxu1 }
 0x12f   :  { %1262 = vst [vmem:[#allocation2 + $0x278] sm:$0xff] %v916_v41 }
 0x130   :  { %v471_v42 = vpop.f32.mrb[40].mxu0 }
 0x131   :  { %1263 = vst [vmem:[#allocation2 + $0x280] sm:$0xff] %v471_v42  ;;  %v920_v43 = vpop.f32.mrb[40].mxu1  ;;  %v473_v44 = vpop.f32.mrb[41].mxu0 }
 0x132   :  { %1265 = vst [vmem:[#allocation2 + $0x290] sm:$0xff] %v920_v43  ;;  %1264 = vst [vmem:[#allocation2 + $0x288] sm:$0xff] %v473_v44  ;;  %v922_v45 = vpop.f32.mrb[41].mxu1 }
 0x133   :  { %1266 = vst [vmem:[#allocation2 + $0x298] sm:$0xff] %v922_v45 }
 0x134   :  { %v477_v46 = vpop.f32.mrb[42].mxu0 }
 0x135   :  { %1267 = vst [vmem:[#allocation2 + $0x2a0] sm:$0xff] %v477_v46  ;;  %v926_v47 = vpop.f32.mrb[42].mxu1  ;;  %v479_v48 = vpop.f32.mrb[43].mxu0 }
 0x136   :  { %1269 = vst [vmem:[#allocation2 + $0x2b0] sm:$0xff] %v926_v47  ;;  %1268 = vst [vmem:[#allocation2 + $0x2a8] sm:$0xff] %v479_v48  ;;  %v928_v49 = vpop.f32.mrb[43].mxu1 }
 0x137   :  { %1270 = vst [vmem:[#allocation2 + $0x2b8] sm:$0xff] %v928_v49 }
 0x138   :  { %v483_v50 = vpop.f32.mrb[44].mxu0 }
 0x139   :  { %1271 = vst [vmem:[#allocation2 + $0x2c0] sm:$0xff] %v483_v50  ;;  %v932_v51 = vpop.f32.mrb[44].mxu1  ;;  %v485_v52 = vpop.f32.mrb[45].mxu0 }
 0x13a   :  { %1273 = vst [vmem:[#allocation2 + $0x2d0] sm:$0xff] %v932_v51  ;;  %1272 = vst [vmem:[#allocation2 + $0x2c8] sm:$0xff] %v485_v52  ;;  %v934_v53 = vpop.f32.mrb[45].mxu1 }
 0x13b   :  { %1274 = vst [vmem:[#allocation2 + $0x2d8] sm:$0xff] %v934_v53 }
 0x13c   :  { %v489_v54 = vpop.f32.mrb[46].mxu0 }
 0x13d   :  { %1275 = vst [vmem:[#allocation2 + $0x2e0] sm:$0xff] %v489_v54  ;;  %v938_v55 = vpop.f32.mrb[46].mxu1  ;;  %v491_v56 = vpop.f32.mrb[47].mxu0 }
 0x13e   :  { %1277 = vst [vmem:[#allocation2 + $0x2f0] sm:$0xff] %v938_v55  ;;  %1276 = vst [vmem:[#allocation2 + $0x2e8] sm:$0xff] %v491_v56  ;;  %v940_v57 = vpop.f32.mrb[47].mxu1 }
 0x13f   :  { %1278 = vst [vmem:[#allocation2 + $0x2f8] sm:$0xff] %v940_v57 }
 0x140   :  { %v495_v58 = vpop.f32.mrb[48].mxu0 }
 0x141   :  { %1279 = vst [vmem:[#allocation2 + $0x300] sm:$0xff] %v495_v58  ;;  %v944_v59 = vpop.f32.mrb[48].mxu1  ;;  %v497_v60 = vpop.f32.mrb[49].mxu0 }
 0x142   :  { %1281 = vst [vmem:[#allocation2 + $0x310] sm:$0xff] %v944_v59  ;;  %1280 = vst [vmem:[#allocation2 + $0x308] sm:$0xff] %v497_v60  ;;  %v946_v61 = vpop.f32.mrb[49].mxu1 }
 0x143   :  { %1282 = vst [vmem:[#allocation2 + $0x318] sm:$0xff] %v946_v61 }
 0x144   :  { %v501_v62 = vpop.f32.mrb[50].mxu0 }
 0x145   :  { %1283 = vst [vmem:[#allocation2 + $0x320] sm:$0xff] %v501_v62  ;;  %v950_v63 = vpop.f32.mrb[50].mxu1  ;;  %v503_v0 = vpop.f32.mrb[51].mxu0 }
 0x146   :  { %1285 = vst [vmem:[#allocation2 + $0x330] sm:$0xff] %v950_v63  ;;  %1284 = vst [vmem:[#allocation2 + $0x328] sm:$0xff] %v503_v0  ;;  %v952_v1 = vpop.f32.mrb[51].mxu1 }
 0x147   :  { %1286 = vst [vmem:[#allocation2 + $0x338] sm:$0xff] %v952_v1 }
 0x148   :  { %v507_v2 = vpop.f32.mrb[52].mxu0 }
 0x149   :  { %1287 = vst [vmem:[#allocation2 + $0x340] sm:$0xff] %v507_v2  ;;  %v956_v3 = vpop.f32.mrb[52].mxu1  ;;  %v509_v4 = vpop.f32.mrb[53].mxu0 }
 0x14a   :  { %1289 = vst [vmem:[#allocation2 + $0x350] sm:$0xff] %v956_v3  ;;  %1288 = vst [vmem:[#allocation2 + $0x348] sm:$0xff] %v509_v4  ;;  %v958_v5 = vpop.f32.mrb[53].mxu1 }
 0x14b   :  { %1290 = vst [vmem:[#allocation2 + $0x358] sm:$0xff] %v958_v5 }
 0x14c   :  { %v513_v6 = vpop.f32.mrb[54].mxu0 }
 0x14d   :  { %1291 = vst [vmem:[#allocation2 + $0x360] sm:$0xff] %v513_v6  ;;  %v962_v8 = vpop.f32.mrb[54].mxu1  ;;  %v515_v9 = vpop.f32.mrb[55].mxu0 }
 0x14e   :  { %1293 = vst [vmem:[#allocation2 + $0x370] sm:$0xff] %v962_v8  ;;  %1292 = vst [vmem:[#allocation2 + $0x368] sm:$0xff] %v515_v9  ;;  %v964_v10 = vpop.f32.mrb[55].mxu1 }
 0x14f   :  { %1294 = vst [vmem:[#allocation2 + $0x378] sm:$0xff] %v964_v10 }
 0x150   :  { %v519_v7 = vpop.f32.mrb[56].mxu0 }
 0x151   :  { %1295 = vst [vmem:[#allocation2 + $0x380] sm:$0xff] %v519_v7  ;;  %v968_v11 = vpop.f32.mrb[56].mxu1  ;;  %v521_v12 = vpop.f32.mrb[57].mxu0 }
 0x152   :  { %1297 = vst [vmem:[#allocation2 + $0x390] sm:$0xff] %v968_v11  ;;  %1296 = vst [vmem:[#allocation2 + $0x388] sm:$0xff] %v521_v12  ;;  %v970_v13 = vpop.f32.mrb[57].mxu1 }
 0x153   :  { %1298 = vst [vmem:[#allocation2 + $0x398] sm:$0xff] %v970_v13 }
 0x154   :  { %v525_v14 = vpop.f32.mrb[58].mxu0 }
 0x155   :  { %1299 = vst [vmem:[#allocation2 + $0x3a0] sm:$0xff] %v525_v14  ;;  %v974_v15 = vpop.f32.mrb[58].mxu1  ;;  %v527_v16 = vpop.f32.mrb[59].mxu0 }
 0x156   :  { %1301 = vst [vmem:[#allocation2 + $0x3b0] sm:$0xff] %v974_v15  ;;  %1300 = vst [vmem:[#allocation2 + $0x3a8] sm:$0xff] %v527_v16  ;;  %v976_v17 = vpop.f32.mrb[59].mxu1 }
 0x157   :  { %1302 = vst [vmem:[#allocation2 + $0x3b8] sm:$0xff] %v976_v17 }
 0x158   :  { %v531_v18 = vpop.f32.mrb[60].mxu0 }
 0x159   :  { %1303 = vst [vmem:[#allocation2 + $0x3c0] sm:$0xff] %v531_v18  ;;  %v980_v19 = vpop.f32.mrb[60].mxu1  ;;  %v533_v20 = vpop.f32.mrb[61].mxu0 }
 0x15a   :  { %1305 = vst [vmem:[#allocation2 + $0x3d0] sm:$0xff] %v980_v19  ;;  %1304 = vst [vmem:[#allocation2 + $0x3c8] sm:$0xff] %v533_v20  ;;  %v982_v21 = vpop.f32.mrb[61].mxu1 }
 0x15b   :  { %1306 = vst [vmem:[#allocation2 + $0x3d8] sm:$0xff] %v982_v21 }
 0x15c   :  { %v537_v22 = vpop.f32.mrb[62].mxu0 }
 0x15d   :  { %1307 = vst [vmem:[#allocation2 + $0x3e0] sm:$0xff] %v537_v22  ;;  %v986_v23 = vpop.f32.mrb[62].mxu1  ;;  %v539_v24 = vpop.f32.mrb[63].mxu0 }
 0x15e   :  { %1309 = vst [vmem:[#allocation2 + $0x3f0] sm:$0xff] %v986_v23  ;;  %1308 = vst [vmem:[#allocation2 + $0x3e8] sm:$0xff] %v539_v24  ;;  %v988_v25 = vpop.f32.mrb[63].mxu1 }
 0x15f   :  { %1310 = vst [vmem:[#allocation2 + $0x3f8] sm:$0xff] %v988_v25 }
 0x160   :  { %v543_v26 = vpop.f32.mrb[64].mxu0 }
 0x161   :  { %1311 = vst [vmem:[#allocation2 + $0x400] sm:$0xff] %v543_v26  ;;  %v992_v27 = vpop.f32.mrb[64].mxu1  ;;  %v545_v28 = vpop.f32.mrb[65].mxu0 }
 0x162   :  { %1313 = vst [vmem:[#allocation2 + $0x410] sm:$0xff] %v992_v27  ;;  %1312 = vst [vmem:[#allocation2 + $0x408] sm:$0xff] %v545_v28  ;;  %v994_v29 = vpop.f32.mrb[65].mxu1 }
 0x163   :  { %1314 = vst [vmem:[#allocation2 + $0x418] sm:$0xff] %v994_v29 }
 0x164   :  { %v549_v30 = vpop.f32.mrb[66].mxu0 }
 0x165   :  { %1315 = vst [vmem:[#allocation2 + $0x420] sm:$0xff] %v549_v30  ;;  %v998_v31 = vpop.f32.mrb[66].mxu1  ;;  %v551_v32 = vpop.f32.mrb[67].mxu0 }
 0x166   :  { %1317 = vst [vmem:[#allocation2 + $0x430] sm:$0xff] %v998_v31  ;;  %1316 = vst [vmem:[#allocation2 + $0x428] sm:$0xff] %v551_v32  ;;  %v1000_v33 = vpop.f32.mrb[67].mxu1 }
 0x167   :  { %1318 = vst [vmem:[#allocation2 + $0x438] sm:$0xff] %v1000_v33 }
 0x168   :  { %v555_v34 = vpop.f32.mrb[68].mxu0 }
 0x169   :  { %1319 = vst [vmem:[#allocation2 + $0x440] sm:$0xff] %v555_v34  ;;  %v1004_v35 = vpop.f32.mrb[68].mxu1  ;;  %v557_v36 = vpop.f32.mrb[69].mxu0 }
 0x16a   :  { %1321 = vst [vmem:[#allocation2 + $0x450] sm:$0xff] %v1004_v35  ;;  %1320 = vst [vmem:[#allocation2 + $0x448] sm:$0xff] %v557_v36  ;;  %v1006_v37 = vpop.f32.mrb[69].mxu1 }
 0x16b   :  { %1322 = vst [vmem:[#allocation2 + $0x458] sm:$0xff] %v1006_v37 }
 0x16c   :  { %v561_v38 = vpop.f32.mrb[70].mxu0 }
 0x16d   :  { %1323 = vst [vmem:[#allocation2 + $0x460] sm:$0xff] %v561_v38  ;;  %v1010_v39 = vpop.f32.mrb[70].mxu1  ;;  %v563_v40 = vpop.f32.mrb[71].mxu0 }
 0x16e   :  { %1325 = vst [vmem:[#allocation2 + $0x470] sm:$0xff] %v1010_v39  ;;  %1324 = vst [vmem:[#allocation2 + $0x468] sm:$0xff] %v563_v40  ;;  %v1012_v41 = vpop.f32.mrb[71].mxu1 }
 0x16f   :  { %1326 = vst [vmem:[#allocation2 + $0x478] sm:$0xff] %v1012_v41 }
 0x170   :  { %v567_v42 = vpop.f32.mrb[72].mxu0 }
 0x171   :  { %1327 = vst [vmem:[#allocation2 + $0x480] sm:$0xff] %v567_v42  ;;  %v1016_v43 = vpop.f32.mrb[72].mxu1  ;;  %v569_v44 = vpop.f32.mrb[73].mxu0 }
 0x172   :  { %1329 = vst [vmem:[#allocation2 + $0x490] sm:$0xff] %v1016_v43  ;;  %1328 = vst [vmem:[#allocation2 + $0x488] sm:$0xff] %v569_v44  ;;  %v1018_v45 = vpop.f32.mrb[73].mxu1 }
 0x173   :  { %1330 = vst [vmem:[#allocation2 + $0x498] sm:$0xff] %v1018_v45 }
 0x174   :  { %v573_v46 = vpop.f32.mrb[74].mxu0 }
 0x175   :  { %1331 = vst [vmem:[#allocation2 + $0x4a0] sm:$0xff] %v573_v46  ;;  %v1022_v47 = vpop.f32.mrb[74].mxu1  ;;  %v575_v48 = vpop.f32.mrb[75].mxu0 }
 0x176   :  { %1333 = vst [vmem:[#allocation2 + $0x4b0] sm:$0xff] %v1022_v47  ;;  %1332 = vst [vmem:[#allocation2 + $0x4a8] sm:$0xff] %v575_v48  ;;  %v1024_v49 = vpop.f32.mrb[75].mxu1 }
 0x177   :  { %1334 = vst [vmem:[#allocation2 + $0x4b8] sm:$0xff] %v1024_v49 }
 0x178   :  { %v579_v50 = vpop.f32.mrb[76].mxu0 }
 0x179   :  { %1335 = vst [vmem:[#allocation2 + $0x4c0] sm:$0xff] %v579_v50  ;;  %v1028_v51 = vpop.f32.mrb[76].mxu1  ;;  %v581_v52 = vpop.f32.mrb[77].mxu0 }
 0x17a   :  { %1337 = vst [vmem:[#allocation2 + $0x4d0] sm:$0xff] %v1028_v51  ;;  %1336 = vst [vmem:[#allocation2 + $0x4c8] sm:$0xff] %v581_v52  ;;  %v1030_v53 = vpop.f32.mrb[77].mxu1 }
 0x17b   :  { %1338 = vst [vmem:[#allocation2 + $0x4d8] sm:$0xff] %v1030_v53 }
 0x17c   :  { %v585_v54 = vpop.f32.mrb[78].mxu0 }
 0x17d   :  { %1339 = vst [vmem:[#allocation2 + $0x4e0] sm:$0xff] %v585_v54  ;;  %v1034_v55 = vpop.f32.mrb[78].mxu1  ;;  %v587_v56 = vpop.f32.mrb[79].mxu0 }
 0x17e   :  { %1341 = vst [vmem:[#allocation2 + $0x4f0] sm:$0xff] %v1034_v55  ;;  %1340 = vst [vmem:[#allocation2 + $0x4e8] sm:$0xff] %v587_v56  ;;  %v1036_v57 = vpop.f32.mrb[79].mxu1 }
 0x17f   :  { %1342 = vst [vmem:[#allocation2 + $0x4f8] sm:$0xff] %v1036_v57 }
 0x180   :  { %v591_v58 = vpop.f32.mrb[80].mxu0 }
 0x181   :  { %1343 = vst [vmem:[#allocation2 + $0x500] sm:$0xff] %v591_v58  ;;  %v1040_v59 = vpop.f32.mrb[80].mxu1  ;;  %v593_v60 = vpop.f32.mrb[81].mxu0 }
 0x182   :  { %1345 = vst [vmem:[#allocation2 + $0x510] sm:$0xff] %v1040_v59  ;;  %1344 = vst [vmem:[#allocation2 + $0x508] sm:$0xff] %v593_v60  ;;  %v1042_v61 = vpop.f32.mrb[81].mxu1 }
 0x183   :  { %1346 = vst [vmem:[#allocation2 + $0x518] sm:$0xff] %v1042_v61 }
 0x184   :  { %v597_v62 = vpop.f32.mrb[82].mxu0 }
 0x185   :  { %1347 = vst [vmem:[#allocation2 + $0x520] sm:$0xff] %v597_v62  ;;  %v1046_v63 = vpop.f32.mrb[82].mxu1  ;;  %v599_v0 = vpop.f32.mrb[83].mxu0 }
 0x186   :  { %1349 = vst [vmem:[#allocation2 + $0x530] sm:$0xff] %v1046_v63  ;;  %1348 = vst [vmem:[#allocation2 + $0x528] sm:$0xff] %v599_v0  ;;  %v1048_v1 = vpop.f32.mrb[83].mxu1 }
 0x187   :  { %1350 = vst [vmem:[#allocation2 + $0x538] sm:$0xff] %v1048_v1 }
 0x188   :  { %v603_v2 = vpop.f32.mrb[84].mxu0 }
 0x189   :  { %1351 = vst [vmem:[#allocation2 + $0x540] sm:$0xff] %v603_v2  ;;  %v1052_v3 = vpop.f32.mrb[84].mxu1  ;;  %v605_v4 = vpop.f32.mrb[85].mxu0 }
 0x18a   :  { %1353 = vst [vmem:[#allocation2 + $0x550] sm:$0xff] %v1052_v3  ;;  %1352 = vst [vmem:[#allocation2 + $0x548] sm:$0xff] %v605_v4  ;;  %v1054_v5 = vpop.f32.mrb[85].mxu1 }
 0x18b   :  { %1354 = vst [vmem:[#allocation2 + $0x558] sm:$0xff] %v1054_v5 }
 0x18c   :  { %v609_v6 = vpop.f32.mrb[86].mxu0 }
 0x18d   :  { %1355 = vst [vmem:[#allocation2 + $0x560] sm:$0xff] %v609_v6  ;;  %v1058_v8 = vpop.f32.mrb[86].mxu1  ;;  %v611_v9 = vpop.f32.mrb[87].mxu0 }
 0x18e   :  { %1357 = vst [vmem:[#allocation2 + $0x570] sm:$0xff] %v1058_v8  ;;  %1356 = vst [vmem:[#allocation2 + $0x568] sm:$0xff] %v611_v9  ;;  %v1060_v10 = vpop.f32.mrb[87].mxu1 }
 0x18f   :  { %1358 = vst [vmem:[#allocation2 + $0x578] sm:$0xff] %v1060_v10 }
 0x190   :  { %v615_v7 = vpop.f32.mrb[88].mxu0 }
 0x191   :  { %1359 = vst [vmem:[#allocation2 + $0x580] sm:$0xff] %v615_v7  ;;  %v1064_v11 = vpop.f32.mrb[88].mxu1  ;;  %v617_v12 = vpop.f32.mrb[89].mxu0 }
 0x192   :  { %1361 = vst [vmem:[#allocation2 + $0x590] sm:$0xff] %v1064_v11  ;;  %1360 = vst [vmem:[#allocation2 + $0x588] sm:$0xff] %v617_v12  ;;  %v1066_v13 = vpop.f32.mrb[89].mxu1 }
 0x193   :  { %1362 = vst [vmem:[#allocation2 + $0x598] sm:$0xff] %v1066_v13 }
 0x194   :  { %v621_v14 = vpop.f32.mrb[90].mxu0 }
 0x195   :  { %1363 = vst [vmem:[#allocation2 + $0x5a0] sm:$0xff] %v621_v14  ;;  %v1070_v15 = vpop.f32.mrb[90].mxu1  ;;  %v623_v16 = vpop.f32.mrb[91].mxu0 }
 0x196   :  { %1365 = vst [vmem:[#allocation2 + $0x5b0] sm:$0xff] %v1070_v15  ;;  %1364 = vst [vmem:[#allocation2 + $0x5a8] sm:$0xff] %v623_v16  ;;  %v1072_v17 = vpop.f32.mrb[91].mxu1 }
 0x197   :  { %1366 = vst [vmem:[#allocation2 + $0x5b8] sm:$0xff] %v1072_v17 }
 0x198   :  { %v627_v18 = vpop.f32.mrb[92].mxu0 }
 0x199   :  { %1367 = vst [vmem:[#allocation2 + $0x5c0] sm:$0xff] %v627_v18  ;;  %v1076_v19 = vpop.f32.mrb[92].mxu1  ;;  %v629_v20 = vpop.f32.mrb[93].mxu0 }
 0x19a   :  { %1369 = vst [vmem:[#allocation2 + $0x5d0] sm:$0xff] %v1076_v19  ;;  %1368 = vst [vmem:[#allocation2 + $0x5c8] sm:$0xff] %v629_v20  ;;  %v1078_v21 = vpop.f32.mrb[93].mxu1 }
 0x19b   :  { %1370 = vst [vmem:[#allocation2 + $0x5d8] sm:$0xff] %v1078_v21 }
 0x19c   :  { %v633_v22 = vpop.f32.mrb[94].mxu0 }
 0x19d   :  { %1371 = vst [vmem:[#allocation2 + $0x5e0] sm:$0xff] %v633_v22  ;;  %v1082_v23 = vpop.f32.mrb[94].mxu1  ;;  %v635_v24 = vpop.f32.mrb[95].mxu0 }
 0x19e   :  { %1373 = vst [vmem:[#allocation2 + $0x5f0] sm:$0xff] %v1082_v23  ;;  %1372 = vst [vmem:[#allocation2 + $0x5e8] sm:$0xff] %v635_v24  ;;  %v1084_v25 = vpop.f32.mrb[95].mxu1 }
 0x19f   :  { %1374 = vst [vmem:[#allocation2 + $0x5f8] sm:$0xff] %v1084_v25 }
 0x1a0   :  { %v639_v26 = vpop.f32.mrb[96].mxu0 }
 0x1a1   :  { %1375 = vst [vmem:[#allocation2 + $0x600] sm:$0xff] %v639_v26  ;;  %v1088_v27 = vpop.f32.mrb[96].mxu1  ;;  %v641_v28 = vpop.f32.mrb[97].mxu0 }
 0x1a2   :  { %1377 = vst [vmem:[#allocation2 + $0x610] sm:$0xff] %v1088_v27  ;;  %1376 = vst [vmem:[#allocation2 + $0x608] sm:$0xff] %v641_v28  ;;  %v1090_v29 = vpop.f32.mrb[97].mxu1 }
 0x1a3   :  { %1378 = vst [vmem:[#allocation2 + $0x618] sm:$0xff] %v1090_v29 }
 0x1a4   :  { %v645_v30 = vpop.f32.mrb[98].mxu0 }
 0x1a5   :  { %1379 = vst [vmem:[#allocation2 + $0x620] sm:$0xff] %v645_v30  ;;  %v1094_v31 = vpop.f32.mrb[98].mxu1  ;;  %v647_v32 = vpop.f32.mrb[99].mxu0 }
 0x1a6   :  { %1381 = vst [vmem:[#allocation2 + $0x630] sm:$0xff] %v1094_v31  ;;  %1380 = vst [vmem:[#allocation2 + $0x628] sm:$0xff] %v647_v32  ;;  %v1096_v33 = vpop.f32.mrb[99].mxu1 }
 0x1a7   :  { %1382 = vst [vmem:[#allocation2 + $0x638] sm:$0xff] %v1096_v33 }
 0x1a8   :  { %v651_v34 = vpop.f32.mrb[100].mxu0 }
 0x1a9   :  { %1383 = vst [vmem:[#allocation2 + $0x640] sm:$0xff] %v651_v34  ;;  %v1100_v35 = vpop.f32.mrb[100].mxu1  ;;  %v653_v36 = vpop.f32.mrb[101].mxu0 }
 0x1aa   :  { %1385 = vst [vmem:[#allocation2 + $0x650] sm:$0xff] %v1100_v35  ;;  %1384 = vst [vmem:[#allocation2 + $0x648] sm:$0xff] %v653_v36  ;;  %v1102_v37 = vpop.f32.mrb[101].mxu1 }
 0x1ab   :  { %1386 = vst [vmem:[#allocation2 + $0x658] sm:$0xff] %v1102_v37 }
 0x1ac   :  { %v657_v38 = vpop.f32.mrb[102].mxu0 }
 0x1ad   :  { %1387 = vst [vmem:[#allocation2 + $0x660] sm:$0xff] %v657_v38  ;;  %v1106_v39 = vpop.f32.mrb[102].mxu1  ;;  %v659_v40 = vpop.f32.mrb[103].mxu0 }
 0x1ae   :  { %1389 = vst [vmem:[#allocation2 + $0x670] sm:$0xff] %v1106_v39  ;;  %1388 = vst [vmem:[#allocation2 + $0x668] sm:$0xff] %v659_v40  ;;  %v1108_v41 = vpop.f32.mrb[103].mxu1 }
 0x1af   :  { %1390 = vst [vmem:[#allocation2 + $0x678] sm:$0xff] %v1108_v41 }
 0x1b0   :  { %v663_v42 = vpop.f32.mrb[104].mxu0 }
 0x1b1   :  { %1391 = vst [vmem:[#allocation2 + $0x680] sm:$0xff] %v663_v42  ;;  %v1112_v43 = vpop.f32.mrb[104].mxu1  ;;  %v665_v44 = vpop.f32.mrb[105].mxu0 }
 0x1b2   :  { %1393 = vst [vmem:[#allocation2 + $0x690] sm:$0xff] %v1112_v43  ;;  %1392 = vst [vmem:[#allocation2 + $0x688] sm:$0xff] %v665_v44  ;;  %v1114_v45 = vpop.f32.mrb[105].mxu1 }
 0x1b3   :  { %1394 = vst [vmem:[#allocation2 + $0x698] sm:$0xff] %v1114_v45 }
 0x1b4   :  { %v669_v46 = vpop.f32.mrb[106].mxu0 }
 0x1b5   :  { %1395 = vst [vmem:[#allocation2 + $0x6a0] sm:$0xff] %v669_v46  ;;  %v1118_v47 = vpop.f32.mrb[106].mxu1  ;;  %v671_v48 = vpop.f32.mrb[107].mxu0 }
 0x1b6   :  { %1397 = vst [vmem:[#allocation2 + $0x6b0] sm:$0xff] %v1118_v47  ;;  %1396 = vst [vmem:[#allocation2 + $0x6a8] sm:$0xff] %v671_v48  ;;  %v1120_v49 = vpop.f32.mrb[107].mxu1 }
 0x1b7   :  { %1398 = vst [vmem:[#allocation2 + $0x6b8] sm:$0xff] %v1120_v49 }
 0x1b8   :  { %v675_v50 = vpop.f32.mrb[108].mxu0 }
 0x1b9   :  { %1399 = vst [vmem:[#allocation2 + $0x6c0] sm:$0xff] %v675_v50  ;;  %v1124_v51 = vpop.f32.mrb[108].mxu1  ;;  %v677_v52 = vpop.f32.mrb[109].mxu0 }
 0x1ba   :  { %1401 = vst [vmem:[#allocation2 + $0x6d0] sm:$0xff] %v1124_v51  ;;  %1400 = vst [vmem:[#allocation2 + $0x6c8] sm:$0xff] %v677_v52  ;;  %v1126_v53 = vpop.f32.mrb[109].mxu1 }
 0x1bb   :  { %1402 = vst [vmem:[#allocation2 + $0x6d8] sm:$0xff] %v1126_v53 }
 0x1bc   :  { %v681_v54 = vpop.f32.mrb[110].mxu0 }
 0x1bd   :  { %1403 = vst [vmem:[#allocation2 + $0x6e0] sm:$0xff] %v681_v54  ;;  %v1130_v55 = vpop.f32.mrb[110].mxu1  ;;  %v683_v56 = vpop.f32.mrb[111].mxu0 }
 0x1be   :  { %1405 = vst [vmem:[#allocation2 + $0x6f0] sm:$0xff] %v1130_v55  ;;  %1404 = vst [vmem:[#allocation2 + $0x6e8] sm:$0xff] %v683_v56  ;;  %v1132_v57 = vpop.f32.mrb[111].mxu1 }
 0x1bf   :  { %1406 = vst [vmem:[#allocation2 + $0x6f8] sm:$0xff] %v1132_v57 }
 0x1c0   :  { %v687_v58 = vpop.f32.mrb[112].mxu0 }
 0x1c1   :  { %1407 = vst [vmem:[#allocation2 + $0x700] sm:$0xff] %v687_v58  ;;  %v1136_v59 = vpop.f32.mrb[112].mxu1  ;;  %v689_v60 = vpop.f32.mrb[113].mxu0 }
 0x1c2   :  { %1409 = vst [vmem:[#allocation2 + $0x710] sm:$0xff] %v1136_v59  ;;  %1408 = vst [vmem:[#allocation2 + $0x708] sm:$0xff] %v689_v60  ;;  %v1138_v61 = vpop.f32.mrb[113].mxu1 }
 0x1c3   :  { %1410 = vst [vmem:[#allocation2 + $0x718] sm:$0xff] %v1138_v61 }
 0x1c4   :  { %v693_v62 = vpop.f32.mrb[114].mxu0 }
 0x1c5   :  { %1411 = vst [vmem:[#allocation2 + $0x720] sm:$0xff] %v693_v62  ;;  %v1142_v63 = vpop.f32.mrb[114].mxu1  ;;  %v695_v0 = vpop.f32.mrb[115].mxu0 }
 0x1c6   :  { %1413 = vst [vmem:[#allocation2 + $0x730] sm:$0xff] %v1142_v63  ;;  %1412 = vst [vmem:[#allocation2 + $0x728] sm:$0xff] %v695_v0  ;;  %v1144_v1 = vpop.f32.mrb[115].mxu1 }
 0x1c7   :  { %1414 = vst [vmem:[#allocation2 + $0x738] sm:$0xff] %v1144_v1 }
 0x1c8   :  { %v699_v2 = vpop.f32.mrb[116].mxu0 }
 0x1c9   :  { %1415 = vst [vmem:[#allocation2 + $0x740] sm:$0xff] %v699_v2  ;;  %v1148_v3 = vpop.f32.mrb[116].mxu1  ;;  %v701_v4 = vpop.f32.mrb[117].mxu0 }
 0x1ca   :  { %1417 = vst [vmem:[#allocation2 + $0x750] sm:$0xff] %v1148_v3  ;;  %1416 = vst [vmem:[#allocation2 + $0x748] sm:$0xff] %v701_v4  ;;  %v1150_v5 = vpop.f32.mrb[117].mxu1 }
 0x1cb   :  { %1418 = vst [vmem:[#allocation2 + $0x758] sm:$0xff] %v1150_v5 }
 0x1cc   :  { %v705_v6 = vpop.f32.mrb[118].mxu0 }
 0x1cd   :  { %1419 = vst [vmem:[#allocation2 + $0x760] sm:$0xff] %v705_v6  ;;  %v1154_v8 = vpop.f32.mrb[118].mxu1  ;;  %v707_v9 = vpop.f32.mrb[119].mxu0 }
 0x1ce   :  { %1421 = vst [vmem:[#allocation2 + $0x770] sm:$0xff] %v1154_v8  ;;  %1420 = vst [vmem:[#allocation2 + $0x768] sm:$0xff] %v707_v9  ;;  %v1156_v10 = vpop.f32.mrb[119].mxu1 }
 0x1cf   :  { %1422 = vst [vmem:[#allocation2 + $0x778] sm:$0xff] %v1156_v10 }
 0x1d0   :  { %v711_v7 = vpop.f32.mrb[120].mxu0 }
 0x1d1   :  { %1423 = vst [vmem:[#allocation2 + $0x780] sm:$0xff] %v711_v7  ;;  %v1160_v11 = vpop.f32.mrb[120].mxu1  ;;  %v713_v12 = vpop.f32.mrb[121].mxu0 }
 0x1d2   :  { %1425 = vst [vmem:[#allocation2 + $0x790] sm:$0xff] %v1160_v11  ;;  %1424 = vst [vmem:[#allocation2 + $0x788] sm:$0xff] %v713_v12  ;;  %v1162_v13 = vpop.f32.mrb[121].mxu1 }
 0x1d3   :  { %1426 = vst [vmem:[#allocation2 + $0x798] sm:$0xff] %v1162_v13 }
 0x1d4   :  { %v717_v14 = vpop.f32.mrb[122].mxu0 }
 0x1d5   :  { %1427 = vst [vmem:[#allocation2 + $0x7a0] sm:$0xff] %v717_v14  ;;  %v1166_v15 = vpop.f32.mrb[122].mxu1  ;;  %v719_v16 = vpop.f32.mrb[123].mxu0 }
 0x1d6   :  { %1429 = vst [vmem:[#allocation2 + $0x7b0] sm:$0xff] %v1166_v15  ;;  %1428 = vst [vmem:[#allocation2 + $0x7a8] sm:$0xff] %v719_v16  ;;  %v1168_v17 = vpop.f32.mrb[123].mxu1 }
 0x1d7   :  { %1430 = vst [vmem:[#allocation2 + $0x7b8] sm:$0xff] %v1168_v17 }
 0x1d8   :  { %v723_v18 = vpop.f32.mrb[124].mxu0 }
 0x1d9   :  { %1431 = vst [vmem:[#allocation2 + $0x7c0] sm:$0xff] %v723_v18  ;;  %v1172_v19 = vpop.f32.mrb[124].mxu1  ;;  %v725_v20 = vpop.f32.mrb[125].mxu0 }
 0x1da   :  { %1433 = vst [vmem:[#allocation2 + $0x7d0] sm:$0xff] %v1172_v19  ;;  %1432 = vst [vmem:[#allocation2 + $0x7c8] sm:$0xff] %v725_v20  ;;  %v1174_v21 = vpop.f32.mrb[125].mxu1 }
 0x1db   :  { %1434 = vst [vmem:[#allocation2 + $0x7d8] sm:$0xff] %v1174_v21 }
 0x1dc   :  { %v729_v22 = vpop.f32.mrb[126].mxu0 }
 0x1dd   :  { %1435 = vst [vmem:[#allocation2 + $0x7e0] sm:$0xff] %v729_v22  ;;  %v1178_v23 = vpop.f32.mrb[126].mxu1  ;;  %v731_v24 = vpop.f32.mrb[127].mxu0 }
 0x1de   :  { %1437 = vst [vmem:[#allocation2 + $0x7f0] sm:$0xff] %v1178_v23  ;;  %1436 = vst [vmem:[#allocation2 + $0x7e8] sm:$0xff] %v731_v24  ;;  %v1180_v25 = vpop.f32.mrb[127].mxu1 }
 0x1df   :  { %1438 = vst [vmem:[#allocation2 + $0x7f8] sm:$0xff] %v1180_v25 }
 0x1e0   :  { %1614 = shalt.err (!%p1611_p4)
}
 0x1e1   :  { %s1615_s28 = scalar_lea.hbm %s2156_s2, 32768 }
 0x1e2   :  { %p1616_p5 = scmp.ne.s32.totalorder %s2156_s2, %s1615_s28  ;;  %p1619_p6 = scmp.lt.u32.totalorder %s1615_s28, %s2156_s2 }
 0x1e4   :  { %p1621_p7 = pnand %p1619_p6, %p1616_p5 }
 0x1e6   :  { %1624 = shalt.err (!%p1621_p7)
}
 0x1e7   :  { %s1629_s5 = smov 512   ;;  %s1630_s6 = smov 32  }
 0x1e8   :  { %1450 = dma.vmem_to_hbm [thread:$0]  %s1445_s24, 32768, %s2156_s2, [#allocation3], %s1629_s5, %s1629_s5, %s1630_s6  }
 0x1e9   :  { %1625 = dma.done.wait [#allocation3], 32768  }
 0x1ea   :  { %1626 = vsyncadd [#allocation3], 4294934528 }
 0x1eb   :  { %1454 = vsyncpa [#allocation3], 1 }

</bundles_post_ra>
